<compile_context>
chip_gen: v6e
topology: v6e:2x2x1
jax: 0.10.0
libtpu: 0.0.40
codegen_flags: <defaults>
</compile_context>

<pallas_src>
import functools
import math

import jax
import jax.numpy as jnp
from jax.experimental import pallas as pl
from jax.experimental.pallas import tpu as pltpu


# ----------------------------- sinusoid table -------------------------------
def get_sinusoid_table(max_len, emb_dim):
    pos = jnp.arange(max_len, dtype=jnp.float32)[:, None]           # (max_len, 1)
    i = jnp.arange(emb_dim, dtype=jnp.int32)[None, :]                # (1, emb_dim)
    exponent = (2 * (i // 2)).astype(jnp.float32) / float(emb_dim)
    angle = pos / jnp.power(10000.0, exponent)                       # (max_len, emb_dim)
    return jnp.where(i % 2 == 0, jnp.sin(angle), jnp.cos(angle)).astype(jnp.float32)


# ----------------------------- Pallas kernel ---------------------------------
def encoder_kernel(
    km_ref, x_ref,
    wqkv_ref, bqkv_ref, wo_ref, bo_ref,
    ln1g_ref, ln1b_ref,
    w1_ref, b1_ref, w2_ref, b2_ref,
    ln2g_ref, ln2b_ref,
    o_ref, *, num_heads):
    l = pl.program_id(0)                    # layer index ("arbitrary")

    # Layer 0: load the embedding output into the VMEM-resident residual stream
    # (the output block itself, which persists across the whole layer grid).
    @pl.when(l == 0)
    def _():
        o_ref[...] = x_ref[...]

    B, S, D = o_ref.shape
    H = num_heads
    hd = D // H

    # Per-layer weights (fetched once per layer, double-buffered by the pipeline).
    wqkv = wqkv_ref[0]                      # (D, 3D) bf16, head-major, q pre-scaled
    bqkv = bqkv_ref[0]                      # (1, 3D) fp32, head-major, q pre-scaled
    wo, bo = wo_ref[0], bo_ref[0]
    ln1g, ln1b = ln1g_ref[0], ln1b_ref[0]
    w1, b1 = w1_ref[0], b1_ref[0]
    w2, b2 = w2_ref[0], b2_ref[0]
    ln2g, ln2b = ln2g_ref[0], ln2b_ref[0]

    def layer_one_item(b):
        x = o_ref[b]                        # (S, D) fp32 residual stream
        km = km_ref[b]                      # (1, S) key-padding mask (int)
        # Additive attention bias built in-kernel (no O(B*S^2) HBM bias).
        # -1e9 instead of -inf avoids NaNs for fully-masked rows.
        bias = jnp.broadcast_to(jnp.where(km == 0, -1e9, 0.0).astype(jnp.float32),
                                (S, S))

        # --- fused QKV projection: bf16 operands, fp32 accumulation on the MXU ---
        xb = x.astype(jnp.bfloat16)
        qkv = jnp.dot(xb, wqkv, preferred_element_type=jnp.float32) + bqkv  # (S, 3D)

        # Head-major layout: columns [h*3hd:(h+1)*3hd] = [q_h | k_h | v_h], so one
        # H-way split yields all of q/k/v per head (scale already folded into q).
        # TODO(synk): replace with pltpu.einshape("s(hc)->hsc", ...) layout transform.
        hstk = jnp.stack([qkv[:, h * 3 * hd:(h + 1) * 3 * hd] for h in range(H)],
                         axis=0).astype(jnp.bfloat16)                 # (H, S, 3hd)
        q3 = hstk[:, :, 0 * hd:1 * hd]
        k3 = hstk[:, :, 1 * hd:2 * hd]
        v3 = hstk[:, :, 2 * hd:3 * hd]

        scores = jnp.einsum('hqd,hkd->hqk', q3, k3,
                            preferred_element_type=jnp.float32)       # (H, S, S)
        scores = scores + bias               # broadcast over heads

        m = jnp.max(scores, axis=-1, keepdims=True)
        p = jnp.exp(scores - m)
        denom = jnp.sum(p, axis=-1, keepdims=True)
        p = p * pl.reciprocal(denom, approx=True)                     # EUP, not VPU divide

        ctx = jnp.einsum('hqk,hkd->hqd', p.astype(jnp.bfloat16), v3,
                         preferred_element_type=jnp.float32)          # (H, S, hd)
        attn = jnp.concatenate([ctx[h] for h in range(H)], axis=-1)   # (S, D)

        mha = jnp.dot(attn.astype(jnp.bfloat16), wo,
                      preferred_element_type=jnp.float32) + bo

        skip1 = mha + x                     # dropout = identity (eval mode)

        # --- layernorm 1 (eps = 1e-6, biased variance, matches the reference) ---
        mu1 = jnp.mean(skip1, axis=-1, keepdims=True)
        var1 = jnp.mean((skip1 - mu1) ** 2, axis=-1, keepdims=True)
        n1 = (skip1 - mu1) * jax.lax.rsqrt(var1 + 1e-6) * ln1g + ln1b

        # --- FFN: Linear -> ReLU -> Linear (bf16 matmuls, fp32 accumulate) ---
        h1 = jnp.dot(n1.astype(jnp.bfloat16), w1,
                     preferred_element_type=jnp.float32) + b1
        h1 = jnp.maximum(h1, 0.0)
        ffn = jnp.dot(h1.astype(jnp.bfloat16), w2,
                      preferred_element_type=jnp.float32) + b2

        skip2 = ffn + n1

        # --- layernorm 2 ---
        mu2 = jnp.mean(skip2, axis=-1, keepdims=True)
        var2 = jnp.mean((skip2 - mu2) ** 2, axis=-1, keepdims=True)
        n2 = (skip2 - mu2) * jax.lax.rsqrt(var2 + 1e-6) * ln2g + ln2b

        o_ref[b] = n2                       # carry residual stream to next layer

    # Static unroll over the small demo batch; one weight fetch serves all items.
    # TODO(synk): use pl.loop(0, B) with dynamic first-axis indexing for large B.
    for b in range(B):
        layer_one_item(b)


# ----------------------------- wrapper ----------------------------------------
def encoder_forward(x_ids, mask, token_emb, sinusoid_table, stacked, num_heads):
    # token / position embedding lookups (glue, plain JAX gather)
    B, S = x_ids.shape
    D = token_emb.shape[1]
    tok = jnp.take(token_emb, x_ids, axis=0)                          # (B, S, D)
    positions = jnp.arange(1, S + 1, dtype=jnp.int32)                 # 1..S
    pos = jnp.take(sinusoid_table, positions, axis=0)[None]           # (1, S, D)
    x = (tok + pos).astype(jnp.float32)                               # dropout = identity

    # Tiny (B, 1, S) key-padding mask passed to the kernel; the additive bias is
    # built in-kernel (no (B, S, S) fp32 bias materialized in HBM).
    # TODO(synk): arbitrary per-query (S, S) masks would need the O(S^2) bias path.
    key_mask = mask[:, 0, 0, :].astype(jnp.int32).reshape(B, 1, S)

    L = stacked["wqkv"].shape[0]
    F = stacked["w1"].shape[-1]
    H = num_heads
    hd = D // H

    cmap = lambda l: (0, 0, 0)   # batch-resident blocks: constant -> DMA'd once
    lmap = lambda l: (l, 0, 0)   # per-layer weights: fetched once per layer

    in_specs = [
        pl.BlockSpec((B, 1, S), cmap),            # key-padding mask
        pl.BlockSpec((B, S, D), cmap),            # embeddings (read at layer 0)
        pl.BlockSpec((1, D, 3 * D), lmap),        # wqkv (bf16, head-major, q scaled)
        pl.BlockSpec((1, 1, 3 * D), lmap),        # bqkv
        pl.BlockSpec((1, D, D), lmap),            # wo (bf16)
        pl.BlockSpec((1, 1, D), lmap),            # bo
        pl.BlockSpec((1, 1, D), lmap),            # ln1 gamma
        pl.BlockSpec((1, 1, D), lmap),            # ln1 beta
        pl.BlockSpec((1, D, F), lmap),            # w1 (bf16)
        pl.BlockSpec((1, 1, F), lmap),            # b1
        pl.BlockSpec((1, F, D), lmap),            # w2 (bf16)
        pl.BlockSpec((1, 1, D), lmap),            # b2
        pl.BlockSpec((1, 1, D), lmap),            # ln2 gamma
        pl.BlockSpec((1, 1, D), lmap),            # ln2 beta
    ]
    # Constant index map => output block is VMEM-resident across all layers
    # (it *is* the residual stream) and written back to HBM exactly once.
    out_spec = pl.BlockSpec((B, S, D), cmap)

    # Advisory cost estimate so XLA schedules the surrounding gathers correctly.
    flops = 2 * B * L * (S * D * 3 * D            # qkv projection
                         + 2 * H * S * S * hd     # scores + context
                         + S * D * D              # output projection
                         + 2 * S * D * F)         # FFN
    transcendentals = B * L * H * S * S           # softmax exp
    bytes_accessed = (
        L * (D * 3 * D + D * D + 2 * D * F) * 2             # bf16 weight matrices
        + L * (3 * D + D + F + D + 4 * D) * 4                # biases + LN params
        + 2 * B * S * D * 4 + B * S * 4)                     # activations in/out + mask

    kernel = functools.partial(encoder_kernel, num_heads=num_heads)
    return pl.pallas_call(
        kernel,
        out_shape=jax.ShapeDtypeStruct((B, S, D), jnp.float32),
        grid=(L,),                                 # layers only: weights DMA'd once each
        in_specs=in_specs,
        out_specs=out_spec,
        compiler_params=pltpu.CompilerParams(
            dimension_semantics=("arbitrary",),    # output block revisited across layers
            vmem_limit_bytes=32 * 1024 * 1024),
        cost_estimate=pl.CostEstimate(flops=int(flops),
                                      transcendentals=int(transcendentals),
                                      bytes_accessed=int(bytes_accessed)),
    )(
        key_mask, x,
        stacked["wqkv"], stacked["bqkv"], stacked["wo"], stacked["bo"],
        stacked["ln1_g"], stacked["ln1_b"],
        stacked["w1"], stacked["b1"], stacked["w2"], stacked["b2"],
        stacked["ln2_g"], stacked["ln2_b"],
    )


# ----------------------------- parameter setup --------------------------------
def init_layer_params(key, emb_dim, forward_dim):
    ks = jax.random.split(key, 6)

    def lin(k, fan_in, fan_out):
        bound = 1.0 / math.sqrt(fan_in)
        kw, kb = jax.random.split(k)
        w = jax.random.uniform(kw, (fan_in, fan_out), jnp.float32, -bound, bound)
        b = jax.random.uniform(kb, (1, fan_out), jnp.float32, -bound, bound)
        return w, b

    wq, bq = lin(ks[0], emb_dim, emb_dim)
    wk, bk = lin(ks[1], emb_dim, emb_dim)
    wv, bv = lin(ks[2], emb_dim, emb_dim)
    wo, bo = lin(ks[3], emb_dim, emb_dim)
    w1, b1 = lin(ks[4], emb_dim, forward_dim)
    w2, b2 = lin(ks[5], forward_dim, emb_dim)
    return dict(
        wq=wq, bq=bq, wk=wk, bk=bk, wv=wv, bv=bv, wo=wo, bo=bo,
        ln1_g=jnp.ones((1, emb_dim), jnp.float32), ln1_b=jnp.zeros((1, emb_dim), jnp.float32),
        w1=w1, b1=b1, w2=w2, b2=b2,
        ln2_g=jnp.ones((1, emb_dim), jnp.float32), ln2_b=jnp.zeros((1, emb_dim), jnp.float32),
    )


def stack_layer_params(layer_params, num_heads):
    """Stack per-layer params with a leading L axis.

    * 1/sqrt(head_dim) is folded into wq / bq (free at param-prep time).
    * QKV is packed HEAD-MAJOR: columns [h*3hd:(h+1)*3hd] = [q_h | k_h | v_h], so the
      kernel splits heads with a single H-way stack of the fused projection output.
    * Weight matrices are cast to bf16 (halves weight DMA / VMEM); biases and LN
      params stay fp32.
    """
    emb_dim = layer_params[0]["wq"].shape[0]
    hd = emb_dim // num_heads
    scale = 1.0 / math.sqrt(hd)

    def pack_qkv(p):
        wq, bq = p["wq"] * scale, p["bq"] * scale     # fold softmax scale into q
        wk, bk, wv, bv = p["wk"], p["bk"], p["wv"], p["bv"]
        w_parts, b_parts = [], []
        for h in range(num_heads):
            sl = slice(h * hd, (h + 1) * hd)
            w_parts += [wq[:, sl], wk[:, sl], wv[:, sl]]
            b_parts += [bq[:, sl], bk[:, sl], bv[:, sl]]
        return (jnp.concatenate(w_parts, axis=1),      # (D, 3D) head-major
                jnp.concatenate(b_parts, axis=1))      # (1, 3D) head-major

    packed = [pack_qkv(p) for p in layer_params]
    wqkv = jnp.stack([w for w, _ in packed], axis=0).astype(jnp.bfloat16)   # (L, D, 3D)
    bqkv = jnp.stack([b for _, b in packed], axis=0)                        # (L, 1, 3D)

    def stack(name, dtype=None):
        a = jnp.stack([p[name] for p in layer_params], axis=0)
        return a.astype(dtype) if dtype is not None else a

    return dict(
        wqkv=wqkv, bqkv=bqkv,
        wo=stack("wo", jnp.bfloat16), bo=stack("bo"),
        ln1_g=stack("ln1_g"), ln1_b=stack("ln1_b"),
        w1=stack("w1", jnp.bfloat16), b1=stack("b1"),
        w2=stack("w2", jnp.bfloat16), b2=stack("b2"),
        ln2_g=stack("ln2_g"), ln2_b=stack("ln2_b"),
    )


# ----------------------------- main --------------------------------------------
if __name__ == "__main__":
    vocab_size = 100
    emb_dim = 32
    num_layers = 2
    num_heads = 4
    forward_dim = 64
    max_len = 16
    B, S = 2, 8

    key = jax.random.PRNGKey(0)
    k_tok, k_ids, *k_layers = jax.random.split(key, 2 + num_layers)

    token_emb = jax.random.normal(k_tok, (vocab_size, emb_dim), jnp.float32) * 0.02
    sinusoid_table = get_sinusoid_table(max_len + 1, emb_dim)
    layer_params = [init_layer_params(k, emb_dim, forward_dim) for k in k_layers]
    stacked = stack_layer_params(layer_params, num_heads)

    x_ids = jax.random.randint(k_ids, (B, S), 0, vocab_size)
    mask = jnp.ones((B, 1, S, S), dtype=jnp.int32)   # no padding -> attend everywhere

    out = encoder_forward(x_ids, mask, token_emb, sinusoid_table, stacked, num_heads)
    jax.block_until_ready(out)
    assert out.shape == (B, S, emb_dim)
    print("KERNEL_OK")
</pallas_src>

<mosaic_0001>
module attributes {stable_mosaic.version = 11 : i64} {
  func.func @encoder_kernel(%arg0: i32, %arg1: memref<2x1x8xi32, #tpu.memory_space<vmem>>, %arg2: memref<2x8x32xf32, #tpu.memory_space<vmem>>, %arg3: memref<1x32x96xbf16, #tpu.memory_space<vmem>>, %arg4: memref<1x1x96xf32, #tpu.memory_space<vmem>>, %arg5: memref<1x32x32xbf16, #tpu.memory_space<vmem>>, %arg6: memref<1x1x32xf32, #tpu.memory_space<vmem>>, %arg7: memref<1x1x32xf32, #tpu.memory_space<vmem>>, %arg8: memref<1x1x32xf32, #tpu.memory_space<vmem>>, %arg9: memref<1x32x64xbf16, #tpu.memory_space<vmem>>, %arg10: memref<1x1x64xf32, #tpu.memory_space<vmem>>, %arg11: memref<1x64x32xbf16, #tpu.memory_space<vmem>>, %arg12: memref<1x1x32xf32, #tpu.memory_space<vmem>>, %arg13: memref<1x1x32xf32, #tpu.memory_space<vmem>>, %arg14: memref<1x1x32xf32, #tpu.memory_space<vmem>>, %arg15: memref<2x8x32xf32, #tpu.memory_space<vmem>>) attributes {dimension_semantics = [#tpu.dimension_semantics<arbitrary>], iteration_bounds = array<i64: 2>, scalar_prefetch = 0 : i64, scratch_operands = 0 : i64, tpu.core_type = #tpu.core_type<tc>, window_params = [{pipeline_mode = #tpu.pipeline_mode<synchronous>, transform_indices = @transform_0, window_bounds = array<i64: 2, 1, 8>}, {pipeline_mode = #tpu.pipeline_mode<synchronous>, transform_indices = @transform_1, window_bounds = array<i64: 2, 8, 32>}, {transform_indices = @transform_2, window_bounds = array<i64: 1, 32, 96>}, {transform_indices = @transform_3, window_bounds = array<i64: 1, 1, 96>}, {transform_indices = @transform_4, window_bounds = array<i64: 1, 32, 32>}, {transform_indices = @transform_5, window_bounds = array<i64: 1, 1, 32>}, {transform_indices = @transform_6, window_bounds = array<i64: 1, 1, 32>}, {transform_indices = @transform_7, window_bounds = array<i64: 1, 1, 32>}, {transform_indices = @transform_8, window_bounds = array<i64: 1, 32, 64>}, {transform_indices = @transform_9, window_bounds = array<i64: 1, 1, 64>}, {transform_indices = @transform_10, window_bounds = array<i64: 1, 64, 32>}, {transform_indices = @transform_11, window_bounds = array<i64: 1, 1, 32>}, {transform_indices = @transform_12, window_bounds = array<i64: 1, 1, 32>}, {transform_indices = @transform_13, window_bounds = array<i64: 1, 1, 32>}, {pipeline_mode = #tpu.pipeline_mode<synchronous>, transform_indices = @transform_14, window_bounds = array<i64: 2, 8, 32>}]} {
    %c0_i32 = arith.constant 0 : i32
    %0 = arith.cmpi eq, %arg0, %c0_i32 : i32
    %1 = arith.extui %0 : i1 to i32
    %c0_i32_0 = arith.constant 0 : i32
    %2 = arith.cmpi ne, %1, %c0_i32_0 : i32
    scf.if %2 {
      %c0_96 = arith.constant 0 : index
      %c0_97 = arith.constant 0 : index
      %c0_98 = arith.constant 0 : index
      %259 = vector.load %arg2[%c0_96, %c0_97, %c0_98] : memref<2x8x32xf32, #tpu.memory_space<vmem>>, vector<2x8x32xf32>
      %c0_99 = arith.constant 0 : index
      %c0_100 = arith.constant 0 : index
      %c0_101 = arith.constant 0 : index
      %260 = vector.load %arg15[%c0_99, %c0_100, %c0_101] : memref<2x8x32xf32, #tpu.memory_space<vmem>>, vector<2x8x32xf32>
      tpu.vector_store %arg15[%c0_99, %c0_100, %c0_101], %259 {strides = array<i32>} : memref<2x8x32xf32, #tpu.memory_space<vmem>>, vector<2x8x32xf32>,
    } else {
    }
    %c0 = arith.constant 0 : index
    %c0_1 = arith.constant 0 : index
    %c0_2 = arith.constant 0 : index
    %3 = vector.load %arg3[%c0, %c0_1, %c0_2] : memref<1x32x96xbf16, #tpu.memory_space<vmem>>, vector<1x32x96xbf16>
    %4 = vector.shape_cast %3 : vector<1x32x96xbf16> to vector<32x96xbf16>
    %c0_3 = arith.constant 0 : index
    %c0_4 = arith.constant 0 : index
    %c0_5 = arith.constant 0 : index
    %5 = vector.load %arg4[%c0_3, %c0_4, %c0_5] : memref<1x1x96xf32, #tpu.memory_space<vmem>>, vector<1x1x96xf32>
    %6 = vector.shape_cast %5 : vector<1x1x96xf32> to vector<1x96xf32>
    %c0_6 = arith.constant 0 : index
    %c0_7 = arith.constant 0 : index
    %c0_8 = arith.constant 0 : index
    %7 = vector.load %arg5[%c0_6, %c0_7, %c0_8] : memref<1x32x32xbf16, #tpu.memory_space<vmem>>, vector<1x32x32xbf16>
    %8 = vector.shape_cast %7 : vector<1x32x32xbf16> to vector<32x32xbf16>
    %c0_9 = arith.constant 0 : index
    %c0_10 = arith.constant 0 : index
    %c0_11 = arith.constant 0 : index
    %9 = vector.load %arg6[%c0_9, %c0_10, %c0_11] : memref<1x1x32xf32, #tpu.memory_space<vmem>>, vector<1x1x32xf32>
    %10 = vector.shape_cast %9 : vector<1x1x32xf32> to vector<1x32xf32>
    %c0_12 = arith.constant 0 : index
    %c0_13 = arith.constant 0 : index
    %c0_14 = arith.constant 0 : index
    %11 = vector.load %arg7[%c0_12, %c0_13, %c0_14] : memref<1x1x32xf32, #tpu.memory_space<vmem>>, vector<1x1x32xf32>
    %12 = vector.shape_cast %11 : vector<1x1x32xf32> to vector<1x32xf32>
    %c0_15 = arith.constant 0 : index
    %c0_16 = arith.constant 0 : index
    %c0_17 = arith.constant 0 : index
    %13 = vector.load %arg8[%c0_15, %c0_16, %c0_17] : memref<1x1x32xf32, #tpu.memory_space<vmem>>, vector<1x1x32xf32>
    %14 = vector.shape_cast %13 : vector<1x1x32xf32> to vector<1x32xf32>
    %c0_18 = arith.constant 0 : index
    %c0_19 = arith.constant 0 : index
    %c0_20 = arith.constant 0 : index
    %15 = vector.load %arg9[%c0_18, %c0_19, %c0_20] : memref<1x32x64xbf16, #tpu.memory_space<vmem>>, vector<1x32x64xbf16>
    %16 = vector.shape_cast %15 : vector<1x32x64xbf16> to vector<32x64xbf16>
    %c0_21 = arith.constant 0 : index
    %c0_22 = arith.constant 0 : index
    %c0_23 = arith.constant 0 : index
    %17 = vector.load %arg10[%c0_21, %c0_22, %c0_23] : memref<1x1x64xf32, #tpu.memory_space<vmem>>, vector<1x1x64xf32>
    %18 = vector.shape_cast %17 : vector<1x1x64xf32> to vector<1x64xf32>
    %c0_24 = arith.constant 0 : index
    %c0_25 = arith.constant 0 : index
    %c0_26 = arith.constant 0 : index
    %19 = vector.load %arg11[%c0_24, %c0_25, %c0_26] : memref<1x64x32xbf16, #tpu.memory_space<vmem>>, vector<1x64x32xbf16>
    %20 = vector.shape_cast %19 : vector<1x64x32xbf16> to vector<64x32xbf16>
    %c0_27 = arith.constant 0 : index
    %c0_28 = arith.constant 0 : index
    %c0_29 = arith.constant 0 : index
    %21 = vector.load %arg12[%c0_27, %c0_28, %c0_29] : memref<1x1x32xf32, #tpu.memory_space<vmem>>, vector<1x1x32xf32>
    %22 = vector.shape_cast %21 : vector<1x1x32xf32> to vector<1x32xf32>
    %c0_30 = arith.constant 0 : index
    %c0_31 = arith.constant 0 : index
    %c0_32 = arith.constant 0 : index
    %23 = vector.load %arg13[%c0_30, %c0_31, %c0_32] : memref<1x1x32xf32, #tpu.memory_space<vmem>>, vector<1x1x32xf32>
    %24 = vector.shape_cast %23 : vector<1x1x32xf32> to vector<1x32xf32>
    %c0_33 = arith.constant 0 : index
    %c0_34 = arith.constant 0 : index
    %c0_35 = arith.constant 0 : index
    %25 = vector.load %arg14[%c0_33, %c0_34, %c0_35] : memref<1x1x32xf32, #tpu.memory_space<vmem>>, vector<1x1x32xf32>
    %26 = vector.shape_cast %25 : vector<1x1x32xf32> to vector<1x32xf32>
    %c0_36 = arith.constant 0 : index
    %c0_37 = arith.constant 0 : index
    %c0_38 = arith.constant 0 : index
    %27 = vector.load %arg15[%c0_36, %c0_37, %c0_38] : memref<2x8x32xf32, #tpu.memory_space<vmem>>, vector<1x8x32xf32>
    %28 = vector.shape_cast %27 : vector<1x8x32xf32> to vector<8x32xf32>
    %c0_39 = arith.constant 0 : index
    %c0_40 = arith.constant 0 : index
    %c0_41 = arith.constant 0 : index
    %29 = vector.load %arg1[%c0_39, %c0_40, %c0_41] : memref<2x1x8xi32, #tpu.memory_space<vmem>>, vector<1x1x8xi32>
    %30 = vector.shape_cast %29 : vector<1x1x8xi32> to vector<1x8xi32>
    %c0_i32_42 = arith.constant 0 : i32
    %31 = vector.broadcast %c0_i32_42 : i32 to vector<1x8xi32>
    %32 = arith.cmpi eq, %30, %31 : vector<1x8xi32>
    %cst = arith.constant -1.000000e+09 : f32
    %cst_43 = arith.constant 0.000000e+00 : f32
    %33 = vector.broadcast %cst : f32 to vector<1x8xf32>
    %34 = vector.broadcast %cst_43 : f32 to vector<1x8xf32>
    %35 = arith.select %32, %33, %34 : vector<1x8xi1>, vector<1x8xf32>
    %36 = vector.shape_cast %35 : vector<1x8xf32> to vector<1x8xf32>
    %37 = vector.broadcast %36 : vector<1x8xf32> to vector<8x8xf32>
    %38 = arith.truncf %28 : vector<8x32xf32> to vector<8x32xbf16>
    %cst_44 = arith.constant dense<0.000000e+00> : vector<8x96xf32>
    %39 = tpu.matmul %38, %4, %cst_44 {dimension_numbers = #tpu.dot_dimension_numbers<[1], [0], [0], [1], [0, 0, 1, 1], [], []>} : vector<8x32xbf16>, vector<32x96xbf16>, vector<8x96xf32> -> vector<8x96xf32>
    %40 = vector.broadcast %6 : vector<1x96xf32> to vector<8x96xf32>
    %41 = arith.addf %39, %40 : vector<8x96xf32>
    %42 = vector.extract_strided_slice %41 {offsets = [0, 0], sizes = [8, 24], strides = [1, 1]} : vector<8x96xf32> to vector<8x24xf32>
    %43 = vector.extract_strided_slice %41 {offsets = [0, 24], sizes = [8, 24], strides = [1, 1]} : vector<8x96xf32> to vector<8x24xf32>
    %44 = vector.extract_strided_slice %41 {offsets = [0, 48], sizes = [8, 24], strides = [1, 1]} : vector<8x96xf32> to vector<8x24xf32>
    %45 = vector.extract_strided_slice %41 {offsets = [0, 72], sizes = [8, 24], strides = [1, 1]} : vector<8x96xf32> to vector<8x24xf32>
    %46 = vector.shape_cast %42 : vector<8x24xf32> to vector<1x8x24xf32>
    %47 = vector.shape_cast %43 : vector<8x24xf32> to vector<1x8x24xf32>
    %48 = vector.shape_cast %44 : vector<8x24xf32> to vector<1x8x24xf32>
    %49 = vector.shape_cast %45 : vector<8x24xf32> to vector<1x8x24xf32>
    %50 = tpu.concatenate %46, %47, %48, %49 in 0 : vector<1x8x24xf32>, vector<1x8x24xf32>, vector<1x8x24xf32>, vector<1x8x24xf32> -> vector<4x8x24xf32>
    %51 = arith.truncf %50 : vector<4x8x24xf32> to vector<4x8x24xbf16>
    %52 = vector.extract_strided_slice %51 {offsets = [0, 0, 0], sizes = [4, 8, 8], strides = [1, 1, 1]} : vector<4x8x24xbf16> to vector<4x8x8xbf16>
    %53 = vector.extract_strided_slice %51 {offsets = [0, 0, 8], sizes = [4, 8, 8], strides = [1, 1, 1]} : vector<4x8x24xbf16> to vector<4x8x8xbf16>
    %54 = vector.extract_strided_slice %51 {offsets = [0, 0, 16], sizes = [4, 8, 8], strides = [1, 1, 1]} : vector<4x8x24xbf16> to vector<4x8x8xbf16>
    "tpu.trace_start"() <{level = 10 : i32, message = "hqd,hkd->hqk"}> : () -> ()
    %cst_45 = arith.constant dense<0.000000e+00> : vector<4x8x8xf32>
    %55 = tpu.matmul %52, %53, %cst_45 {dimension_numbers = #tpu.dot_dimension_numbers<[2], [2], [1], [1], [0, 0, 0, 1, 1, 1], [0], [0]>} : vector<4x8x8xbf16>, vector<4x8x8xbf16>, vector<4x8x8xf32> -> vector<4x8x8xf32>
    "tpu.trace_stop"() : () -> ()
    %56 = vector.shape_cast %37 : vector<8x8xf32> to vector<1x8x8xf32>
    %57 = vector.broadcast %56 : vector<1x8x8xf32> to vector<4x8x8xf32>
    %58 = arith.addf %55, %57 : vector<4x8x8xf32>
    %cst_46 = arith.constant dense<0xFF800000> : vector<4x8xf32>
    %59 = vector.multi_reduction <maximumf>, %58, %cst_46 [2] : vector<4x8x8xf32> to vector<4x8xf32>
    %60 = vector.shape_cast %59 : vector<4x8xf32> to vector<4x8x1xf32>
    %61 = vector.broadcast %60 : vector<4x8x1xf32> to vector<4x8x8xf32>
    %62 = arith.subf %58, %61 : vector<4x8x8xf32>
    %63 = math.exp %62 : vector<4x8x8xf32>
    %cst_47 = arith.constant dense<0.000000e+00> : vector<4x8xf32>
    %64 = vector.multi_reduction <add>, %63, %cst_47 [2] : vector<4x8x8xf32> to vector<4x8xf32>
    %65 = vector.shape_cast %64 : vector<4x8xf32> to vector<4x8x1xf32>
    %66 = tpu.reciprocal %65 {approx = true} : vector<4x8x1xf32> -> vector<4x8x1xf32>
    %67 = vector.broadcast %66 : vector<4x8x1xf32> to vector<4x8x8xf32>
    %68 = arith.mulf %63, %67 : vector<4x8x8xf32>
    %69 = arith.truncf %68 : vector<4x8x8xf32> to vector<4x8x8xbf16>
    "tpu.trace_start"() <{level = 10 : i32, message = "hqk,hkd->hqd"}> : () -> ()
    %cst_48 = arith.constant dense<0.000000e+00> : vector<4x8x8xf32>
    %70 = tpu.matmul %69, %54, %cst_48 {dimension_numbers = #tpu.dot_dimension_numbers<[2], [1], [1], [2], [0, 0, 0, 1, 1, 2], [0], [0]>} : vector<4x8x8xbf16>, vector<4x8x8xbf16>, vector<4x8x8xf32> -> vector<4x8x8xf32>
    "tpu.trace_stop"() : () -> ()
    %71 = vector.extract_strided_slice %70 {offsets = [0, 0, 0], sizes = [1, 8, 8], strides = [1, 1, 1]} : vector<4x8x8xf32> to vector<1x8x8xf32>
    %72 = vector.shape_cast %71 : vector<1x8x8xf32> to vector<8x8xf32>
    %73 = vector.extract_strided_slice %70 {offsets = [1, 0, 0], sizes = [1, 8, 8], strides = [1, 1, 1]} : vector<4x8x8xf32> to vector<1x8x8xf32>
    %74 = vector.shape_cast %73 : vector<1x8x8xf32> to vector<8x8xf32>
    %75 = vector.extract_strided_slice %70 {offsets = [2, 0, 0], sizes = [1, 8, 8], strides = [1, 1, 1]} : vector<4x8x8xf32> to vector<1x8x8xf32>
    %76 = vector.shape_cast %75 : vector<1x8x8xf32> to vector<8x8xf32>
    %77 = vector.extract_strided_slice %70 {offsets = [3, 0, 0], sizes = [1, 8, 8], strides = [1, 1, 1]} : vector<4x8x8xf32> to vector<1x8x8xf32>
    %78 = vector.shape_cast %77 : vector<1x8x8xf32> to vector<8x8xf32>
    %79 = tpu.concatenate %72, %74, %76, %78 in 1 : vector<8x8xf32>, vector<8x8xf32>, vector<8x8xf32>, vector<8x8xf32> -> vector<8x32xf32>
    %80 = arith.truncf %79 : vector<8x32xf32> to vector<8x32xbf16>
    %cst_49 = arith.constant dense<0.000000e+00> : vector<8x32xf32>
    %81 = tpu.matmul %80, %8, %cst_49 {dimension_numbers = #tpu.dot_dimension_numbers<[1], [0], [0], [1], [0, 0, 1, 1], [], []>} : vector<8x32xbf16>, vector<32x32xbf16>, vector<8x32xf32> -> vector<8x32xf32>
    %82 = vector.broadcast %10 : vector<1x32xf32> to vector<8x32xf32>
    %83 = arith.addf %81, %82 : vector<8x32xf32>
    %84 = arith.addf %83, %28 : vector<8x32xf32>
    %cst_50 = arith.constant dense<0.000000e+00> : vector<8xf32>
    %85 = vector.multi_reduction <add>, %84, %cst_50 [1] : vector<8x32xf32> to vector<8xf32>
    %86 = vector.shape_cast %85 : vector<8xf32> to vector<8x1xf32>
    %cst_51 = arith.constant 3.200000e+01 : f32
    %87 = vector.broadcast %cst_51 : f32 to vector<8x1xf32>
    %88 = arith.divf %86, %87 : vector<8x1xf32>
    %89 = vector.broadcast %88 : vector<8x1xf32> to vector<8x32xf32>
    %90 = arith.subf %84, %89 : vector<8x32xf32>
    %91 = arith.mulf %90, %90 : vector<8x32xf32>
    %cst_52 = arith.constant dense<0.000000e+00> : vector<8xf32>
    %92 = vector.multi_reduction <add>, %91, %cst_52 [1] : vector<8x32xf32> to vector<8xf32>
    %93 = vector.shape_cast %92 : vector<8xf32> to vector<8x1xf32>
    %cst_53 = arith.constant 3.200000e+01 : f32
    %94 = vector.broadcast %cst_53 : f32 to vector<8x1xf32>
    %95 = arith.divf %93, %94 : vector<8x1xf32>
    %96 = vector.broadcast %88 : vector<8x1xf32> to vector<8x32xf32>
    %97 = arith.subf %84, %96 : vector<8x32xf32>
    %cst_54 = arith.constant 9.99999997E-7 : f32
    %98 = vector.broadcast %cst_54 : f32 to vector<8x1xf32>
    %99 = arith.addf %95, %98 : vector<8x1xf32>
    %100 = math.rsqrt %99 : vector<8x1xf32>
    %101 = vector.broadcast %100 : vector<8x1xf32> to vector<8x32xf32>
    %102 = arith.mulf %97, %101 : vector<8x32xf32>
    %103 = vector.broadcast %12 : vector<1x32xf32> to vector<8x32xf32>
    %104 = arith.mulf %102, %103 : vector<8x32xf32>
    %105 = vector.broadcast %14 : vector<1x32xf32> to vector<8x32xf32>
    %106 = arith.addf %104, %105 : vector<8x32xf32>
    %107 = arith.truncf %106 : vector<8x32xf32> to vector<8x32xbf16>
    %cst_55 = arith.constant dense<0.000000e+00> : vector<8x64xf32>
    %108 = tpu.matmul %107, %16, %cst_55 {dimension_numbers = #tpu.dot_dimension_numbers<[1], [0], [0], [1], [0, 0, 1, 1], [], []>} : vector<8x32xbf16>, vector<32x64xbf16>, vector<8x64xf32> -> vector<8x64xf32>
    %109 = vector.broadcast %18 : vector<1x64xf32> to vector<8x64xf32>
    %110 = arith.addf %108, %109 : vector<8x64xf32>
    %cst_56 = arith.constant 0.000000e+00 : f32
    %111 = vector.broadcast %cst_56 : f32 to vector<8x64xf32>
    %112 = arith.maximumf %110, %111 : vector<8x64xf32>
    %113 = arith.truncf %112 : vector<8x64xf32> to vector<8x64xbf16>
    %cst_57 = arith.constant dense<0.000000e+00> : vector<8x32xf32>
    %114 = tpu.matmul %113, %20, %cst_57 {dimension_numbers = #tpu.dot_dimension_numbers<[1], [0], [0], [1], [0, 0, 1, 1], [], []>} : vector<8x64xbf16>, vector<64x32xbf16>, vector<8x32xf32> -> vector<8x32xf32>
    %115 = vector.broadcast %22 : vector<1x32xf32> to vector<8x32xf32>
    %116 = arith.addf %114, %115 : vector<8x32xf32>
    %117 = arith.addf %116, %106 : vector<8x32xf32>
    %cst_58 = arith.constant dense<0.000000e+00> : vector<8xf32>
    %118 = vector.multi_reduction <add>, %117, %cst_58 [1] : vector<8x32xf32> to vector<8xf32>
    %119 = vector.shape_cast %118 : vector<8xf32> to vector<8x1xf32>
    %cst_59 = arith.constant 3.200000e+01 : f32
    %120 = vector.broadcast %cst_59 : f32 to vector<8x1xf32>
    %121 = arith.divf %119, %120 : vector<8x1xf32>
    %122 = vector.broadcast %121 : vector<8x1xf32> to vector<8x32xf32>
    %123 = arith.subf %117, %122 : vector<8x32xf32>
    %124 = arith.mulf %123, %123 : vector<8x32xf32>
    %cst_60 = arith.constant dense<0.000000e+00> : vector<8xf32>
    %125 = vector.multi_reduction <add>, %124, %cst_60 [1] : vector<8x32xf32> to vector<8xf32>
    %126 = vector.shape_cast %125 : vector<8xf32> to vector<8x1xf32>
    %cst_61 = arith.constant 3.200000e+01 : f32
    %127 = vector.broadcast %cst_61 : f32 to vector<8x1xf32>
    %128 = arith.divf %126, %127 : vector<8x1xf32>
    %129 = vector.broadcast %121 : vector<8x1xf32> to vector<8x32xf32>
    %130 = arith.subf %117, %129 : vector<8x32xf32>
    %cst_62 = arith.constant 9.99999997E-7 : f32
    %131 = vector.broadcast %cst_62 : f32 to vector<8x1xf32>
    %132 = arith.addf %128, %131 : vector<8x1xf32>
    %133 = math.rsqrt %132 : vector<8x1xf32>
    %134 = vector.broadcast %133 : vector<8x1xf32> to vector<8x32xf32>
    %135 = arith.mulf %130, %134 : vector<8x32xf32>
    %136 = vector.broadcast %24 : vector<1x32xf32> to vector<8x32xf32>
    %137 = arith.mulf %135, %136 : vector<8x32xf32>
    %138 = vector.broadcast %26 : vector<1x32xf32> to vector<8x32xf32>
    %139 = arith.addf %137, %138 : vector<8x32xf32>
    %c0_63 = arith.constant 0 : index
    %c0_64 = arith.constant 0 : index
    %c0_65 = arith.constant 0 : index
    %140 = vector.load %arg15[%c0_63, %c0_64, %c0_65] : memref<2x8x32xf32, #tpu.memory_space<vmem>>, vector<1x8x32xf32>
    %141 = vector.shape_cast %140 : vector<1x8x32xf32> to vector<8x32xf32>
    %142 = vector.shape_cast %139 : vector<8x32xf32> to vector<1x8x32xf32>
    tpu.vector_store %arg15[%c0_63, %c0_64, %c0_65], %142 {strides = array<i32>} : memref<2x8x32xf32, #tpu.memory_space<vmem>>, vector<1x8x32xf32>,
    %c1 = arith.constant 1 : index
    %c0_66 = arith.constant 0 : index
    %c0_67 = arith.constant 0 : index
    %143 = vector.load %arg15[%c1, %c0_66, %c0_67] : memref<2x8x32xf32, #tpu.memory_space<vmem>>, vector<1x8x32xf32>
    %144 = vector.shape_cast %143 : vector<1x8x32xf32> to vector<8x32xf32>
    %c1_68 = arith.constant 1 : index
    %c0_69 = arith.constant 0 : index
    %c0_70 = arith.constant 0 : index
    %145 = vector.load %arg1[%c1_68, %c0_69, %c0_70] : memref<2x1x8xi32, #tpu.memory_space<vmem>>, vector<1x1x8xi32>
    %146 = vector.shape_cast %145 : vector<1x1x8xi32> to vector<1x8xi32>
    %c0_i32_71 = arith.constant 0 : i32
    %147 = vector.broadcast %c0_i32_71 : i32 to vector<1x8xi32>
    %148 = arith.cmpi eq, %146, %147 : vector<1x8xi32>
    %cst_72 = arith.constant -1.000000e+09 : f32
    %cst_73 = arith.constant 0.000000e+00 : f32
    %149 = vector.broadcast %cst_72 : f32 to vector<1x8xf32>
    %150 = vector.broadcast %cst_73 : f32 to vector<1x8xf32>
    %151 = arith.select %148, %149, %150 : vector<1x8xi1>, vector<1x8xf32>
    %152 = vector.shape_cast %151 : vector<1x8xf32> to vector<1x8xf32>
    %153 = vector.broadcast %152 : vector<1x8xf32> to vector<8x8xf32>
    %154 = arith.truncf %144 : vector<8x32xf32> to vector<8x32xbf16>
    %cst_74 = arith.constant dense<0.000000e+00> : vector<8x96xf32>
    %155 = tpu.matmul %154, %4, %cst_74 {dimension_numbers = #tpu.dot_dimension_numbers<[1], [0], [0], [1], [0, 0, 1, 1], [], []>} : vector<8x32xbf16>, vector<32x96xbf16>, vector<8x96xf32> -> vector<8x96xf32>
    %156 = vector.broadcast %6 : vector<1x96xf32> to vector<8x96xf32>
    %157 = arith.addf %155, %156 : vector<8x96xf32>
    %158 = vector.extract_strided_slice %157 {offsets = [0, 0], sizes = [8, 24], strides = [1, 1]} : vector<8x96xf32> to vector<8x24xf32>
    %159 = vector.extract_strided_slice %157 {offsets = [0, 24], sizes = [8, 24], strides = [1, 1]} : vector<8x96xf32> to vector<8x24xf32>
    %160 = vector.extract_strided_slice %157 {offsets = [0, 48], sizes = [8, 24], strides = [1, 1]} : vector<8x96xf32> to vector<8x24xf32>
    %161 = vector.extract_strided_slice %157 {offsets = [0, 72], sizes = [8, 24], strides = [1, 1]} : vector<8x96xf32> to vector<8x24xf32>
    %162 = vector.shape_cast %158 : vector<8x24xf32> to vector<1x8x24xf32>
    %163 = vector.shape_cast %159 : vector<8x24xf32> to vector<1x8x24xf32>
    %164 = vector.shape_cast %160 : vector<8x24xf32> to vector<1x8x24xf32>
    %165 = vector.shape_cast %161 : vector<8x24xf32> to vector<1x8x24xf32>
    %166 = tpu.concatenate %162, %163, %164, %165 in 0 : vector<1x8x24xf32>, vector<1x8x24xf32>, vector<1x8x24xf32>, vector<1x8x24xf32> -> vector<4x8x24xf32>
    %167 = arith.truncf %166 : vector<4x8x24xf32> to vector<4x8x24xbf16>
    %168 = vector.extract_strided_slice %167 {offsets = [0, 0, 0], sizes = [4, 8, 8], strides = [1, 1, 1]} : vector<4x8x24xbf16> to vector<4x8x8xbf16>
    %169 = vector.extract_strided_slice %167 {offsets = [0, 0, 8], sizes = [4, 8, 8], strides = [1, 1, 1]} : vector<4x8x24xbf16> to vector<4x8x8xbf16>
    %170 = vector.extract_strided_slice %167 {offsets = [0, 0, 16], sizes = [4, 8, 8], strides = [1, 1, 1]} : vector<4x8x24xbf16> to vector<4x8x8xbf16>
    "tpu.trace_start"() <{level = 10 : i32, message = "hqd,hkd->hqk"}> : () -> ()
    %cst_75 = arith.constant dense<0.000000e+00> : vector<4x8x8xf32>
    %171 = tpu.matmul %168, %169, %cst_75 {dimension_numbers = #tpu.dot_dimension_numbers<[2], [2], [1], [1], [0, 0, 0, 1, 1, 1], [0], [0]>} : vector<4x8x8xbf16>, vector<4x8x8xbf16>, vector<4x8x8xf32> -> vector<4x8x8xf32>
    "tpu.trace_stop"() : () -> ()
    %172 = vector.shape_cast %153 : vector<8x8xf32> to vector<1x8x8xf32>
    %173 = vector.broadcast %172 : vector<1x8x8xf32> to vector<4x8x8xf32>
    %174 = arith.addf %171, %173 : vector<4x8x8xf32>
    %cst_76 = arith.constant dense<0xFF800000> : vector<4x8xf32>
    %175 = vector.multi_reduction <maximumf>, %174, %cst_76 [2] : vector<4x8x8xf32> to vector<4x8xf32>
    %176 = vector.shape_cast %175 : vector<4x8xf32> to vector<4x8x1xf32>
    %177 = vector.broadcast %176 : vector<4x8x1xf32> to vector<4x8x8xf32>
    %178 = arith.subf %174, %177 : vector<4x8x8xf32>
    %179 = math.exp %178 : vector<4x8x8xf32>
    %cst_77 = arith.constant dense<0.000000e+00> : vector<4x8xf32>
    %180 = vector.multi_reduction <add>, %179, %cst_77 [2] : vector<4x8x8xf32> to vector<4x8xf32>
    %181 = vector.shape_cast %180 : vector<4x8xf32> to vector<4x8x1xf32>
    %182 = tpu.reciprocal %181 {approx = true} : vector<4x8x1xf32> -> vector<4x8x1xf32>
    %183 = vector.broadcast %182 : vector<4x8x1xf32> to vector<4x8x8xf32>
    %184 = arith.mulf %179, %183 : vector<4x8x8xf32>
    %185 = arith.truncf %184 : vector<4x8x8xf32> to vector<4x8x8xbf16>
    "tpu.trace_start"() <{level = 10 : i32, message = "hqk,hkd->hqd"}> : () -> ()
    %cst_78 = arith.constant dense<0.000000e+00> : vector<4x8x8xf32>
    %186 = tpu.matmul %185, %170, %cst_78 {dimension_numbers = #tpu.dot_dimension_numbers<[2], [1], [1], [2], [0, 0, 0, 1, 1, 2], [0], [0]>} : vector<4x8x8xbf16>, vector<4x8x8xbf16>, vector<4x8x8xf32> -> vector<4x8x8xf32>
    "tpu.trace_stop"() : () -> ()
    %187 = vector.extract_strided_slice %186 {offsets = [0, 0, 0], sizes = [1, 8, 8], strides = [1, 1, 1]} : vector<4x8x8xf32> to vector<1x8x8xf32>
    %188 = vector.shape_cast %187 : vector<1x8x8xf32> to vector<8x8xf32>
    %189 = vector.extract_strided_slice %186 {offsets = [1, 0, 0], sizes = [1, 8, 8], strides = [1, 1, 1]} : vector<4x8x8xf32> to vector<1x8x8xf32>
    %190 = vector.shape_cast %189 : vector<1x8x8xf32> to vector<8x8xf32>
    %191 = vector.extract_strided_slice %186 {offsets = [2, 0, 0], sizes = [1, 8, 8], strides = [1, 1, 1]} : vector<4x8x8xf32> to vector<1x8x8xf32>
    %192 = vector.shape_cast %191 : vector<1x8x8xf32> to vector<8x8xf32>
    %193 = vector.extract_strided_slice %186 {offsets = [3, 0, 0], sizes = [1, 8, 8], strides = [1, 1, 1]} : vector<4x8x8xf32> to vector<1x8x8xf32>
    %194 = vector.shape_cast %193 : vector<1x8x8xf32> to vector<8x8xf32>
    %195 = tpu.concatenate %188, %190, %192, %194 in 1 : vector<8x8xf32>, vector<8x8xf32>, vector<8x8xf32>, vector<8x8xf32> -> vector<8x32xf32>
    %196 = arith.truncf %195 : vector<8x32xf32> to vector<8x32xbf16>
    %cst_79 = arith.constant dense<0.000000e+00> : vector<8x32xf32>
    %197 = tpu.matmul %196, %8, %cst_79 {dimension_numbers = #tpu.dot_dimension_numbers<[1], [0], [0], [1], [0, 0, 1, 1], [], []>} : vector<8x32xbf16>, vector<32x32xbf16>, vector<8x32xf32> -> vector<8x32xf32>
    %198 = vector.broadcast %10 : vector<1x32xf32> to vector<8x32xf32>
    %199 = arith.addf %197, %198 : vector<8x32xf32>
    %200 = arith.addf %199, %144 : vector<8x32xf32>
    %cst_80 = arith.constant dense<0.000000e+00> : vector<8xf32>
    %201 = vector.multi_reduction <add>, %200, %cst_80 [1] : vector<8x32xf32> to vector<8xf32>
    %202 = vector.shape_cast %201 : vector<8xf32> to vector<8x1xf32>
    %cst_81 = arith.constant 3.200000e+01 : f32
    %203 = vector.broadcast %cst_81 : f32 to vector<8x1xf32>
    %204 = arith.divf %202, %203 : vector<8x1xf32>
    %205 = vector.broadcast %204 : vector<8x1xf32> to vector<8x32xf32>
    %206 = arith.subf %200, %205 : vector<8x32xf32>
    %207 = arith.mulf %206, %206 : vector<8x32xf32>
    %cst_82 = arith.constant dense<0.000000e+00> : vector<8xf32>
    %208 = vector.multi_reduction <add>, %207, %cst_82 [1] : vector<8x32xf32> to vector<8xf32>
    %209 = vector.shape_cast %208 : vector<8xf32> to vector<8x1xf32>
    %cst_83 = arith.constant 3.200000e+01 : f32
    %210 = vector.broadcast %cst_83 : f32 to vector<8x1xf32>
    %211 = arith.divf %209, %210 : vector<8x1xf32>
    %212 = vector.broadcast %204 : vector<8x1xf32> to vector<8x32xf32>
    %213 = arith.subf %200, %212 : vector<8x32xf32>
    %cst_84 = arith.constant 9.99999997E-7 : f32
    %214 = vector.broadcast %cst_84 : f32 to vector<8x1xf32>
    %215 = arith.addf %211, %214 : vector<8x1xf32>
    %216 = math.rsqrt %215 : vector<8x1xf32>
    %217 = vector.broadcast %216 : vector<8x1xf32> to vector<8x32xf32>
    %218 = arith.mulf %213, %217 : vector<8x32xf32>
    %219 = vector.broadcast %12 : vector<1x32xf32> to vector<8x32xf32>
    %220 = arith.mulf %218, %219 : vector<8x32xf32>
    %221 = vector.broadcast %14 : vector<1x32xf32> to vector<8x32xf32>
    %222 = arith.addf %220, %221 : vector<8x32xf32>
    %223 = arith.truncf %222 : vector<8x32xf32> to vector<8x32xbf16>
    %cst_85 = arith.constant dense<0.000000e+00> : vector<8x64xf32>
    %224 = tpu.matmul %223, %16, %cst_85 {dimension_numbers = #tpu.dot_dimension_numbers<[1], [0], [0], [1], [0, 0, 1, 1], [], []>} : vector<8x32xbf16>, vector<32x64xbf16>, vector<8x64xf32> -> vector<8x64xf32>
    %225 = vector.broadcast %18 : vector<1x64xf32> to vector<8x64xf32>
    %226 = arith.addf %224, %225 : vector<8x64xf32>
    %cst_86 = arith.constant 0.000000e+00 : f32
    %227 = vector.broadcast %cst_86 : f32 to vector<8x64xf32>
    %228 = arith.maximumf %226, %227 : vector<8x64xf32>
    %229 = arith.truncf %228 : vector<8x64xf32> to vector<8x64xbf16>
    %cst_87 = arith.constant dense<0.000000e+00> : vector<8x32xf32>
    %230 = tpu.matmul %229, %20, %cst_87 {dimension_numbers = #tpu.dot_dimension_numbers<[1], [0], [0], [1], [0, 0, 1, 1], [], []>} : vector<8x64xbf16>, vector<64x32xbf16>, vector<8x32xf32> -> vector<8x32xf32>
    %231 = vector.broadcast %22 : vector<1x32xf32> to vector<8x32xf32>
    %232 = arith.addf %230, %231 : vector<8x32xf32>
    %233 = arith.addf %232, %222 : vector<8x32xf32>
    %cst_88 = arith.constant dense<0.000000e+00> : vector<8xf32>
    %234 = vector.multi_reduction <add>, %233, %cst_88 [1] : vector<8x32xf32> to vector<8xf32>
    %235 = vector.shape_cast %234 : vector<8xf32> to vector<8x1xf32>
    %cst_89 = arith.constant 3.200000e+01 : f32
    %236 = vector.broadcast %cst_89 : f32 to vector<8x1xf32>
    %237 = arith.divf %235, %236 : vector<8x1xf32>
    %238 = vector.broadcast %237 : vector<8x1xf32> to vector<8x32xf32>
    %239 = arith.subf %233, %238 : vector<8x32xf32>
    %240 = arith.mulf %239, %239 : vector<8x32xf32>
    %cst_90 = arith.constant dense<0.000000e+00> : vector<8xf32>
    %241 = vector.multi_reduction <add>, %240, %cst_90 [1] : vector<8x32xf32> to vector<8xf32>
    %242 = vector.shape_cast %241 : vector<8xf32> to vector<8x1xf32>
    %cst_91 = arith.constant 3.200000e+01 : f32
    %243 = vector.broadcast %cst_91 : f32 to vector<8x1xf32>
    %244 = arith.divf %242, %243 : vector<8x1xf32>
    %245 = vector.broadcast %237 : vector<8x1xf32> to vector<8x32xf32>
    %246 = arith.subf %233, %245 : vector<8x32xf32>
    %cst_92 = arith.constant 9.99999997E-7 : f32
    %247 = vector.broadcast %cst_92 : f32 to vector<8x1xf32>
    %248 = arith.addf %244, %247 : vector<8x1xf32>
    %249 = math.rsqrt %248 : vector<8x1xf32>
    %250 = vector.broadcast %249 : vector<8x1xf32> to vector<8x32xf32>
    %251 = arith.mulf %246, %250 : vector<8x32xf32>
    %252 = vector.broadcast %24 : vector<1x32xf32> to vector<8x32xf32>
    %253 = arith.mulf %251, %252 : vector<8x32xf32>
    %254 = vector.broadcast %26 : vector<1x32xf32> to vector<8x32xf32>
    %255 = arith.addf %253, %254 : vector<8x32xf32>
    %c1_93 = arith.constant 1 : index
    %c0_94 = arith.constant 0 : index
    %c0_95 = arith.constant 0 : index
    %256 = vector.load %arg15[%c1_93, %c0_94, %c0_95] : memref<2x8x32xf32, #tpu.memory_space<vmem>>, vector<1x8x32xf32>
    %257 = vector.shape_cast %256 : vector<1x8x32xf32> to vector<8x32xf32>
    %258 = vector.shape_cast %255 : vector<8x32xf32> to vector<1x8x32xf32>
    tpu.vector_store %arg15[%c1_93, %c0_94, %c0_95], %258 {strides = array<i32>} : memref<2x8x32xf32, #tpu.memory_space<vmem>>, vector<1x8x32xf32>,
    return
  }
  func.func @transform_0(%arg0: i32) -> (i32, i32, i32) {
    %c0_i32 = arith.constant 0 : i32
    %c0_i32_0 = arith.constant 0 : i32
    %c0_i32_1 = arith.constant 0 : i32
    %c0_i32_2 = arith.constant 0 : i32
    return %c0_i32, %c0_i32_0, %c0_i32_1 : i32, i32, i32
  }
  func.func @transform_1(%arg0: i32) -> (i32, i32, i32) {
    %c0_i32 = arith.constant 0 : i32
    %c0_i32_0 = arith.constant 0 : i32
    %c0_i32_1 = arith.constant 0 : i32
    %c0_i32_2 = arith.constant 0 : i32
    return %c0_i32, %c0_i32_0, %c0_i32_1 : i32, i32, i32
  }
  func.func @transform_2(%arg0: i32) -> (i32, i32, i32) {
    %c0_i32 = arith.constant 0 : i32
    %c0_i32_0 = arith.constant 0 : i32
    %c0_i32_1 = arith.constant 0 : i32
    return %arg0, %c0_i32, %c0_i32_0 : i32, i32, i32
  }
  func.func @transform_3(%arg0: i32) -> (i32, i32, i32) {
    %c0_i32 = arith.constant 0 : i32
    %c0_i32_0 = arith.constant 0 : i32
    %c0_i32_1 = arith.constant 0 : i32
    return %arg0, %c0_i32, %c0_i32_0 : i32, i32, i32
  }
  func.func @transform_4(%arg0: i32) -> (i32, i32, i32) {
    %c0_i32 = arith.constant 0 : i32
    %c0_i32_0 = arith.constant 0 : i32
    %c0_i32_1 = arith.constant 0 : i32
    return %arg0, %c0_i32, %c0_i32_0 : i32, i32, i32
  }
  func.func @transform_5(%arg0: i32) -> (i32, i32, i32) {
    %c0_i32 = arith.constant 0 : i32
    %c0_i32_0 = arith.constant 0 : i32
    %c0_i32_1 = arith.constant 0 : i32
    return %arg0, %c0_i32, %c0_i32_0 : i32, i32, i32
  }
  func.func @transform_6(%arg0: i32) -> (i32, i32, i32) {
    %c0_i32 = arith.constant 0 : i32
    %c0_i32_0 = arith.constant 0 : i32
    %c0_i32_1 = arith.constant 0 : i32
    return %arg0, %c0_i32, %c0_i32_0 : i32, i32, i32
  }
  func.func @transform_7(%arg0: i32) -> (i32, i32, i32) {
    %c0_i32 = arith.constant 0 : i32
    %c0_i32_0 = arith.constant 0 : i32
    %c0_i32_1 = arith.constant 0 : i32
    return %arg0, %c0_i32, %c0_i32_0 : i32, i32, i32
  }
  func.func @transform_8(%arg0: i32) -> (i32, i32, i32) {
    %c0_i32 = arith.constant 0 : i32
    %c0_i32_0 = arith.constant 0 : i32
    %c0_i32_1 = arith.constant 0 : i32
    return %arg0, %c0_i32, %c0_i32_0 : i32, i32, i32
  }
  func.func @transform_9(%arg0: i32) -> (i32, i32, i32) {
    %c0_i32 = arith.constant 0 : i32
    %c0_i32_0 = arith.constant 0 : i32
    %c0_i32_1 = arith.constant 0 : i32
    return %arg0, %c0_i32, %c0_i32_0 : i32, i32, i32
  }
  func.func @transform_10(%arg0: i32) -> (i32, i32, i32) {
    %c0_i32 = arith.constant 0 : i32
    %c0_i32_0 = arith.constant 0 : i32
    %c0_i32_1 = arith.constant 0 : i32
    return %arg0, %c0_i32, %c0_i32_0 : i32, i32, i32
  }
  func.func @transform_11(%arg0: i32) -> (i32, i32, i32) {
    %c0_i32 = arith.constant 0 : i32
    %c0_i32_0 = arith.constant 0 : i32
    %c0_i32_1 = arith.constant 0 : i32
    return %arg0, %c0_i32, %c0_i32_0 : i32, i32, i32
  }
  func.func @transform_12(%arg0: i32) -> (i32, i32, i32) {
    %c0_i32 = arith.constant 0 : i32
    %c0_i32_0 = arith.constant 0 : i32
    %c0_i32_1 = arith.constant 0 : i32
    return %arg0, %c0_i32, %c0_i32_0 : i32, i32, i32
  }
  func.func @transform_13(%arg0: i32) -> (i32, i32, i32) {
    %c0_i32 = arith.constant 0 : i32
    %c0_i32_0 = arith.constant 0 : i32
    %c0_i32_1 = arith.constant 0 : i32
    return %arg0, %c0_i32, %c0_i32_0 : i32, i32, i32
  }
  func.func @transform_14(%arg0: i32) -> (i32, i32, i32) {
    %c0_i32 = arith.constant 0 : i32
    %c0_i32_0 = arith.constant 0 : i32
    %c0_i32_1 = arith.constant 0 : i32
    %c0_i32_2 = arith.constant 0 : i32
    return %c0_i32, %c0_i32_0, %c0_i32_1 : i32, i32, i32
  }
}

</mosaic_0001>

<bundles_post_ra>
// kernel: tpu_custom_call.1
= control target key start
LH: loop header
LB: loop body
LE: loop exit
PB: predicated region body
PF: predicated region fallthrough
CT: control target
= control target key end

     0   :  { %s3429_s0 = inlined_call_operand.hbm [shape: s32[2,1,8], index: 0, kind: input, shape index: {}]   ;;  %s3430_s1 = inlined_call_operand.hbm [shape: f32[2,8,32], index: 1, kind: input, shape index: {}]   ;;  %s3431_s2 = inlined_call_operand.vmem [shape: bf16[2,32,96], index: 2, kind: input, shape index: {}]   ;;  %s3432_s3 = inlined_call_operand.vmem [shape: f32[2,1,96], index: 3, kind: input, shape index: {}]   ;;  %s3433_s4 = inlined_call_operand.vmem [shape: bf16[2,32,32], index: 4, kind: input, shape index: {}]   ;;  %s3434_s5 = inlined_call_operand.vmem [shape: f32[2,1,32], index: 5, kind: input, shape index: {}]   ;;  %s3435_s6 = inlined_call_operand.vmem [shape: f32[2,1,32], index: 6, kind: input, shape index: {}]   ;;  %s3436_s7 = inlined_call_operand.vmem [shape: f32[2,1,32], index: 7, kind: input, shape index: {}]   ;;  %s3437_s8 = inlined_call_operand.vmem [shape: bf16[2,32,64], index: 8, kind: input, shape index: {}]   ;;  %s3438_s9 = inlined_call_operand.vmem [shape: f32[2,1,64], index: 9, kind: input, shape index: {}]   ;;  %s3439_s10 = inlined_call_operand.vmem [shape: bf16[2,64,32], index: 10, kind: input, shape index: {}]   ;;  %s3440_s11 = inlined_call_operand.vmem [shape: f32[2,1,32], index: 11, kind: input, shape index: {}]   ;;  %s3441_s12 = inlined_call_operand.vmem [shape: f32[2,1,32], index: 12, kind: input, shape index: {}]   ;;  %s3442_s13 = inlined_call_operand.vmem [shape: f32[2,1,32], index: 13, kind: input, shape index: {}]   ;;  %s3443_s14 = inlined_call_operand.hbm [shape: f32[2,8,32], index: 14, kind: output, shape index: {}]  }
   0x1   :  { %3445 = sst [smem:[#allocation12_spill]] %s3429_s0 }
   0x2   :  { %3446 = sst [smem:[#allocation13_spill]] %s3430_s1 }
   0x3   :  { %3447 = sst [smem:[#allocation14_spill]] %s3431_s2 }
   0x4   :  { %3448 = sst [smem:[#allocation15_spill]] %s3433_s4 }
   0x5   :  { %3449 = sst [smem:[#allocation16_spill]] %s3443_s14 }
   0x6   :  { %19 = vsyncpa [#allocation3], 0 }
   0x7   :  { %20 = vsyncpa [#allocation6], 0 }
   0x8   :  { %21 = vsyncpa [#allocation4], 0  ;;  %s2944_s29 = smov 0  }
   0x9 LB: > { %3450 = sst [smem:[#allocation11_spill]] %s2849_s29  ;;  %s2851_s30 = smov [#allocation2]   ;;  %s2849_s29 = sphi %s2944_s29, %s27_s29  }
   0xa   : > { %s419_s15 = sshll.u32 %s2851_s30, 4  ;;  %s2950_s16 = sadd.s32 4294967295, %s2849_s29   ;;  %s420_s15 = int_to_ptr.vmem [resolvable:$true] %s419_s15 }
   0xb   : > { %p2360_p0 = scmp.ge.s32.totalorder %s2849_s29, 1  ;;  %p407_p1 = scmp.lt.s32.totalorder %s2849_s29, 3 }
   0xc   : > { %p2673_p4 = scmp.eq.s32.totalorder %s2950_s16, 0  ;;  %s2852_s18 = smov [#allocation5]  }
   0xd   : > { %p2955_p3 = pnand %p2360_p0, %p407_p1  ;;  %s432_s19 = sshll.u32 %s2852_s18, 4  ;;  %s433_s19 = int_to_ptr.vmem [resolvable:$true] %s432_s19 }
   0xe   : > { %s2766_s21 = scalar_lea.vmem %s420_s15, 32  ;;  %p2774_p11 = scmp.lt.s32.totalorder %s420_s15, %s420_s15 }
   0xf   : > { %p2666_p5 = pneg %p2955_p3  ;;  %p2767_p8 = scmp.ne.s32.totalorder %s420_s15, %s2766_s21 }
  0x10   : > { %p2775_p12 = scmp.lt.s32.totalorder %s2766_s21, %s2766_s21 }
  0x11   : > { %p2964_p6 = pnand %p2673_p4, %p2666_p5 }
  0x12   : > { %p2776_p13 = por %p2775_p12, %p2774_p11 }
  0x13   : > { %p2757_p7 = pneg %p2964_p6 }
  0x15   : > { %p2769_p9 = pnand %p2767_p8, %p2757_p7 }
  0x17   : > { %p2770_p10 = pneg %p2769_p9 }
  0x19   : > { %p2777_p0 = pnand %p2776_p13, %p2770_p10 }
  0x1b   : > { %2780 = shalt.err (!%p2777_p0)
}
  0x1c   : > { %s2853_s22 = smov 16   ;;  %s2854_s23 = smov 1  }
  0x1d   : > { %s3453_s0 = sld [smem:[#allocation12_spill]]  ;;  %s2792_s26 = scalar_lea.vmem %s433_s19, 256 }
  0x1e   : > { %p2793_p1 = scmp.ne.s32.totalorder %s433_s19, %s2792_s26  ;;  %p2800_p9 = scmp.lt.s32.totalorder %s433_s19, %s433_s19 }
  0x1f   : > { %p2801_p2 = scmp.lt.s32.totalorder %s2792_s26, %s2792_s26 }
  0x20   : > { %p2795_p5 = pnand %p2793_p1, %p2757_p7 }
  0x21   : > { %p2802_p11 = por %p2801_p2, %p2800_p9 }
  0x22   : > { %p2796_p8 = pneg %p2795_p5 }
  0x23   : > { %2669 = dma.hbm_to_vmem [thread:$0]  (!%p2964_p6), %s3453_s0, 32, %s420_s15, [#allocation3], %s2853_s22, %s2853_s22, %s2854_s23  }
  0x24   : > { %p2803_p10 = pnand %p2802_p11, %p2796_p8 }
  0x26   : > { %2806 = shalt.err (!%p2803_p10)
}
  0x27   : > { %s2855_s27 = smov 128   ;;  %s2856_s28 = smov 8  }
  0x28   : > { %s3454_s1 = sld [smem:[#allocation13_spill]] }
  0x2a   : > { %528 = sbr.rel (%p2955_p3) target bundleno = 4338 (0x10f2), region = 76 }
  0x2e   : > { %2672 = dma.hbm_to_vmem [thread:$0]  (!%p2964_p6), %s3454_s1, 256, %s433_s19, [#allocation6], %s2855_s27, %s2855_s27, %s2856_s28  }
  0x2f   : > { %2836 = dma.done.wait (%p2673_p4), [#allocation3], 32  }
  0x30   : > { %2838 = vsyncadd (%p2673_p4), [#allocation3], 4294967264 }
  0x31   : > { %2840 = dma.done.wait (%p2673_p4), [#allocation6], 256  }
  0x32   : > { %2842 = vsyncadd (%p2673_p4), [#allocation6], 4294967040  ;;  %p612_p2 = scmp.lt.s32.totalorder %s2950_s16, 1  ;;  %s3455_s2 = sld [smem:[#allocation14_spill]] }
  0x33   : > { %s3456_s4 = sld [smem:[#allocation15_spill]]  ;;  %p3457_p3 = scmp.ne.s32.totalorder %s2950_s16, 0 }
  0x34   : > { %s2998_s15 = scalar_select %p612_p2, %s2950_s16, 1 }
  0x36   : > { %s2422_s17 = sshll.u32 %s2998_s15, 4  ;;  %s649_s14 = scalar_lea.vmem %s3440_s11, %s2998_s15 }
  0x37   : > { %s3028_s23 = scalar_lea.vmem %s3437_s8, %s2422_s17  ;;  %s652_s21 = scalar_lea.vmem %s3441_s12, %s2998_s15 }
  0x38   : > { %s616_s24 = scalar_lea.vmem %s3455_s2, %s2422_s17  ;;  %s641_s2 = scalar_lea.vmem %s3438_s9, %s2998_s15 }
  0x39   : > { %s3011_s27 = scalar_lea.vmem %s3456_s4, %s2422_s17  ;;  %s2425_s4 = sshll.u32 %s2998_s15, 5 }
  0x3a   : > { %s3038_s18 = scalar_lea.vmem %s3439_s10, %s2425_s4  ;;  %s655_s29 = scalar_lea.vmem %s3442_s13, %s2998_s15 }
  0x3b   : > { %660 = sbr.rel (%p3457_p3) target bundleno = 66 (0x42), region = 88 }
  0x40   : > { %v661_v0 = vld [vmem:[#allocation5] sm:$0xff]  ;;  %vm663_vm0 = vcmask 261120   ;;  %v662_v1 = vld [vmem:[#allocation5 + $0x8] sm:$0xff] }
  0x41   : > { %664 = vst.msk [vmem:[#allocation7] sm:$0xff] %vm663_vm0, %v661_v0  ;;  %665 = vst.msk [vmem:[#allocation7 + $0x8] sm:$0xff] %vm663_vm0, %v662_v1 }
  0x42 PF: > { %v3054_v2 = vld [vmem:[%s616_s24 + $0x8] sm:$0xff]   ;;  %v2857_v3 = vmov 0.0   ;;  %v3059_v4 = vld [vmem:[%s616_s24] sm:$0xff]   ;;  %vm2858_vm1 = vmmov 0   ;;  %vm717_vm2 = vcmask 261120   ;;  %s3458_s20 = scalar_lea.vmem %s3432_s3, %s2998_s15  ;;  %s2859_s25 = smov 56   ;;  %v776_v28 = vlaneseq }
  0x43   : > { %2486 = vmatprep.subr.bf16.mxu1 %v2857_v3  ;;  %2500 = vmatprep.subr.bf16.mxu0 %v2857_v3  ;;  %v3080_v7 = vld [vmem:[%s3458_s20] ss:$0 sm:$0xff]  ;;  %s2860_s26 = smov 104   ;;  %s2861_s28 = smov 80   ;;  %vm784_vm3 = vcmask 64512   ;;  %vm1031_vm5 = vcmask 1043456  }
  0x44   : > { %2487 = vmatpush3.bf16.msra.mxu1 %v3054_v2  ;;  %2490 = vmatprep.mubr.msk.bf16.mxu1 %vm2858_vm1, %v2857_v3  ;;  %s2862_s30 = smov 120   ;;  %v695_v29 = vld [vmem:[#allocation2] sm:$0x1]  ;;  %v3126_v30 = vshrl.u32 %v776_v28, 7  ;;  %s2863_s0 = smov 112   ;;  %vm1232_vm6 = vcmask 130048  }
  0x45   : > { %2488 = vmatprep.subr.bf16.mxu1 %v2857_v3  ;;  %2502 = vmatprep.mubr.msk.bf16.mxu0 %vm2858_vm1, %v2857_v3  ;;  %vm696_vm4 = vcmp.eq.s32.totalorder %v695_v29, 0  ;;  %s2864_s1 = smov 8   ;;  %s2865_s19 = smov 16   ;;  %vm1234_vm7 = vcmask 195584   ;;  %vm1421_vm8 = vcmask 523264  }
  0x46   : > { %v778_v31 = vsub.s32 0, %v3126_v30  ;;  %v697_v32 = vsel %vm696_vm4, -1e+09, %v2857_v3  ;;  %s3459_s4 = scalar_lea.vmem %s3434_s5, %s2998_s15  ;;  %s3460_s20 = scalar_lea.vmem %s3435_s6, %s2998_s15 }
  0x47   : > { %p2677_p4 = scmp.eq.s32.totalorder %s2950_s16, 1 }
  0x48   : > { %v3063_v5 = vld [vmem:[#allocation7] sm:$0xff]  ;;  %2489 = vmatpush3.bf16.msra.mxu1 %v3059_v4  ;;  %v779_v33 = vrot.slane %v697_v32, %v778_v31 }
  0x49   : > { %v698_v6 = vpack.c.bf16 %v3063_v5, %v3063_v5  ;;  %2494 = vmatprep.subr.bf16.mxu1 %v2857_v3 }
  0x4b   : > { %2491 = vmatmul.mubr.msk.bf16.vlgmr.msra.gmra.mxu1 %vm717_vm2, %v698_v6 }
  0x4c   : > { %2496 = vmatprep.mubr.msk.bf16.mxu1 %vm2858_vm1, %v2857_v3 }
 0x10b   : > { %v755_v8 = vpop.f32.mrf.mxu1 }
 0x10c   : > { %v756_v9 = vadd.f32 %v3080_v7, %v755_v8 }
 0x10d   : > { %v2492_v10 = vpop.f32.mrf.mxu1 }
 0x10e   : > { %768 = vrot.lane.b32.xlu1 %v756_v9, %s2859_s25  ;;  %762 = vrot.lane.b32.xlu0 %v756_v9, %s2860_s26  ;;  %v3085_v12 = vpack.c.bf16 %v756_v9, %v756_v9 }
 0x10f   : > { %v758_v11 = vpop.f32.mrf.mxu1 }
 0x111   : > { %v2493_v13 = vpop.f32.mrf.mxu1 }
 0x112   : > { %765 = vrot.lane.b32.xlu0 %v756_v9, %s2861_s28  ;;  %782 = vrot.lane.b32.xlu1 %v3085_v12, %s2862_s30 }
 0x180   : > { %v769_v14 = vpop.permute.xlu1 %768  ;;  %v763_v15 = vpop.permute.xlu0 %762 }
 0x181   : > { %v3090_v16 = vpack.c.bf16 %v763_v15, %v763_v15  ;;  %v3094_v19 = vpack.c.bf16 %v769_v14, %v769_v14 }
 0x183   : > { %832 = vrot.lane.b32.xlu0 %v3090_v16, %s2862_s30 }
 0x184   : > { %v766_v17 = vpop.permute.xlu0 %765  ;;  %v783_v18 = vpop.permute.xlu1 %782 }
 0x185   : > { %v3096_v20 = vpack.c.bf16 %v766_v17, %v766_v17  ;;  %v789_v21 = vsel %vm784_vm3, %v783_v18, 0 }
 0x186   : > { %2495 = vmatpush3.bf16.xpose.msra.mxu1 %v789_v21 }
 0x187   : > { %930 = vrot.lane.b32.xlu0 %v3094_v19, %s2862_s30  ;;  %881 = vrot.lane.b32.xlu1 %v3096_v20, %s2862_s30 }
 0x188   : > { %2506 = vmatprep.subr.bf16.mxu1 %v2857_v3 }
 0x18d   : > { %2497 = vmatmul.mubr.msk.bf16.vlgmr.msra.gmra.mxu1 %vm784_vm3, %v3085_v12 }
 0x18e   : > { %2508 = vmatprep.mubr.msk.bf16.mxu1 %vm2858_vm1, %v2857_v3 }
 0x1f5   : > { %v833_v22 = vpop.permute.xlu0 %832 }
 0x1f6   : > { %v838_v23 = vsel %vm784_vm3, %v833_v22, 0 }
 0x1f7   : > { %2501 = vmatpush3.bf16.xpose.msra.mxu0 %v838_v23 }
 0x1f8   : > { %2512 = vmatprep.subr.bf16.mxu0 %v2857_v3 }
 0x1f9   : > { %v882_v24 = vpop.permute.xlu1 %881  ;;  %v931_v26 = vpop.permute.xlu0 %930 }
 0x1fa   : > { %v887_v25 = vsel %vm784_vm3, %v882_v24, 0  ;;  %v936_v27 = vsel %vm784_vm3, %v931_v26, 0 }
 0x1fb   : > { %2507 = vmatpush3.bf16.xpose.msra.mxu1 %v887_v25 }
 0x1fc   : > { %2518 = vmatprep.subr.bf16.mxu1 %v2857_v3 }
 0x1fe   : > { %2503 = vmatmul.mubr.msk.bf16.vlgmr.msra.gmra.mxu0 %vm784_vm3, %v3090_v16 }
 0x1ff   : > { %2513 = vmatpush3.bf16.xpose.msra.mxu0 %v936_v27  ;;  %2514 = vmatprep.mubr.msk.bf16.mxu0 %vm2858_vm1, %v2857_v3 }
 0x200   : > { %2524 = vmatprep.subr.bf16.mxu0 %v2857_v3 }
 0x202   : > { %2509 = vmatmul.mubr.msk.bf16.vlgmr.msra.gmra.mxu1 %vm784_vm3, %v3096_v20 }
 0x203   : > { %2520 = vmatprep.mubr.msk.bf16.mxu1 %vm2858_vm1, %v2857_v3 }
 0x206   : > { %2515 = vmatmul.mubr.msk.bf16.vlgmr.msra.gmra.mxu0 %vm784_vm3, %v3094_v19 }
 0x207   : > { %2526 = vmatprep.mubr.msk.bf16.mxu0 %vm2858_vm1, %v2857_v3 }
 0x24d   : > { %v825_v34 = vpop.f32.mrf.mxu1 }
 0x24e   : > { %v826_v35 = vadd.f32 %v825_v34, %v779_v33 }
 0x24f   : > { %v2498_v36 = vpop.f32.mrf.mxu1 }
 0x250   : > { %v978_v37 = vsel %vm784_vm3, %v826_v35, -inf }
 0x251   : > { %979 = vmax.xlane.f32.xlu1 %v978_v37  ;;  %v828_v38 = vpop.f32.mrf.mxu1 }
 0x253   : > { %v2499_v39 = vpop.f32.mrf.mxu1 }
 0x2be   : > { %v874_v40 = vpop.f32.mrf.mxu0 }
 0x2bf   : > { %v875_v41 = vadd.f32 %v874_v40, %v779_v33 }
 0x2c0   : > { %v2504_v42 = vpop.f32.mrf.mxu0 }
 0x2c1   : > { %v981_v43 = vsel %vm784_vm3, %v875_v41, -inf }
 0x2c2   : > { %982 = vmax.xlane.f32.xlu0 %v981_v43  ;;  %v877_v44 = vpop.f32.mrf.mxu0  ;;  %v923_v45 = vpop.f32.mrf.mxu1 }
 0x2c3   : > { %v924_v46 = vadd.f32 %v923_v45, %v779_v33 }
 0x2c4   : > { %v2505_v47 = vpop.f32.mrf.mxu0  ;;  %v2510_v48 = vpop.f32.mrf.mxu1 }
 0x2c5   : > { %v984_v49 = vsel %vm784_vm3, %v924_v46, -inf }
 0x2c6   : > { %v972_v50 = vpop.f32.mrf.mxu0  ;;  %985 = vmax.xlane.f32.xlu0 %v984_v49  ;;  %v926_v51 = vpop.f32.mrf.mxu1  ;;  %v3169_v49 = vld [vmem:[%s3011_s27 + $0x8] sm:$0xff]  }
 0x2c7   : > { %v973_v52 = vadd.f32 %v972_v50, %v779_v33  ;;  %v3174_v50 = vld [vmem:[%s3011_s27] sm:$0xff]   ;;  %s2866_s27 = smov 24  }
 0x2c8   : > { %v2511_v53 = vpop.f32.mrf.mxu1  ;;  %v2516_v54 = vpop.f32.mrf.mxu0 }
 0x2c9   : > { %v987_v55 = vsel %vm784_vm3, %v973_v52, -inf }
 0x2ca   : > { %v975_v56 = vpop.f32.mrf.mxu0  ;;  %988 = vmax.xlane.f32.xlu1 %v987_v55 }
 0x2cc   : > { %v2517_v57 = vpop.f32.mrf.mxu0 }
 0x2da   : > { %v980_v58 = vpop.xlane.xlu1 %979 }
 0x2db   : > { %1075 = vrot.lane.b32.xlu1 %v3090_v16, %s2863_s0  ;;  %v990_v59 = vsub.f32 %v826_v35, %v980_v58 }
 0x2dc   : > { %1026 = vrot.lane.b32.xlu0 %v3085_v12, %s2863_s0 }
 0x2dd   : > { %v994_v60 = vmul.f32 1.442695, %v990_v59 }
 0x2df   : > { %2715 = vpow2.f32 %v994_v60 }
 0x2ec   : > { %v2716_v61 = vpop.eup %2715 }
 0x2ed   : > { %v1002_v62 = vsel %vm784_vm3, %v2716_v61, 0.0 }
 0x2fb   : > { %1003 = vadd.xlane.f32.xlu0 %v1002_v62 }
 0x34b   : > { %v983_v63 = vpop.xlane.xlu0 %982 }
 0x34c   : > { %v991_v0 = vsub.f32 %v875_v41, %v983_v63 }
 0x34e   : > { %v996_v1 = vmul.f32 1.442695, %v991_v0 }
 0x34f   : > { %v986_v6 = vpop.xlane.xlu0 %985 }
 0x350   : > { %2717 = vpow2.f32 %v996_v1  ;;  %v992_v8 = vsub.f32 %v924_v46, %v986_v6 }
 0x352   : > { %v998_v9 = vmul.f32 1.442695, %v992_v8 }
 0x353   : > { %v989_v10 = vpop.xlane.xlu1 %988  ;;  %v1027_v11 = vpop.permute.xlu0 %1026 }
 0x354   : > { %2719 = vpow2.f32 %v998_v9  ;;  %v993_v12 = vsub.f32 %v973_v52, %v989_v10  ;;  %v1033_v13 = vsel %vm1031_vm5, %v1027_v11, 0  ;;  %v3192_v11 = vld [vmem:[%s3459_s4] ss:$0 sm:$0xff]  ;;  %s3461_s4 = scalar_lea.vmem %s3436_s7, %s2998_s15 }
 0x355   : > { %2519 = vmatpush3.bf16.msra.mxu1 %v1033_v13 }
 0x356   : > { %v1000_v14 = vmul.f32 1.442695, %v993_v12  ;;  %2530 = vmatprep.subr.bf16.mxu1 %v2857_v3 }
 0x357   : > { %v1076_v15 = vpop.permute.xlu1 %1075 }
 0x358   : > { %2721 = vpow2.f32 %v1000_v14  ;;  %v1081_v16 = vsel %vm1031_vm5, %v1076_v15, 0 }
 0x359   : > { %2525 = vmatpush3.bf16.msra.mxu0 %v1081_v16 }
 0x35a   : > { %2536 = vmatprep.subr.bf16.mxu0 %v2857_v3 }
 0x35d   : > { %v2718_v17 = vpop.eup %2717 }
 0x35e   : > { %v1005_v18 = vsel %vm784_vm3, %v2718_v17, 0.0 }
 0x35f   : > { %1006 = vadd.xlane.f32.xlu1 %v1005_v18 }
 0x361   : > { %v2720_v21 = vpop.eup %2719 }
 0x362   : > { %v1008_v22 = vsel %vm784_vm3, %v2720_v21, 0.0 }
 0x363   : > { %1009 = vadd.xlane.f32.xlu0 %v1008_v22 }
 0x365   : > { %v2722_v23 = vpop.eup %2721 }
 0x366   : > { %v1011_v24 = vsel %vm784_vm3, %v2722_v23, 0.0 }
 0x367   : > { %1012 = vadd.xlane.f32.xlu1 %v1011_v24 }
 0x378   : > { %1123 = vrot.lane.b32.xlu1 %v3096_v20, %s2863_s0 }
 0x379   : > { %1171 = vrot.lane.b32.xlu0 %v3094_v19, %s2863_s0 }
 0x384   : > { %v1004_v25 = vpop.xlane.xlu0 %1003 }
 0x385   : > { %2723 = vrcp.f32 %v1004_v25 }
 0x392   : > { %v2724_v26 = vpop.eup %2723 }
 0x393   : > { %v1018_v27 = vmul.f32 %v2724_v26, %v2716_v61  ;;  %v3199_v26 = vld [vmem:[%s3028_s23 + $0x8] sm:$0xff]  }
 0x395   : > { %v1022_v28 = vpack.c.bf16 %v1018_v27, %v1018_v27  ;;  %v3209_v27 = vld [vmem:[%s3038_s18 + $0x18] sm:$0xff]  }
 0x397   : > { %2521 = vmatmul.mubr.msk.bf16.vlgmr.msra.gmra.mxu1 %vm784_vm3, %v1022_v28  ;;  %v3213_v28 = vld [vmem:[%s3038_s18 + $0x10] sm:$0xff]  }
 0x398   : > { %2532 = vmatprep.mubr.msk.bf16.mxu1 %vm2858_vm1, %v2857_v3 }
 0x3e8   : > { %v1007_v29 = vpop.xlane.xlu1 %1006 }
 0x3e9   : > { %2725 = vrcp.f32 %v1007_v29 }
 0x3ec   : > { %v1010_v32 = vpop.xlane.xlu0 %1009 }
 0x3ed   : > { %2727 = vrcp.f32 %v1010_v32 }
 0x3f0   : > { %v1013_v33 = vpop.xlane.xlu1 %1012  ;;  %v1172_v36 = vpop.permute.xlu0 %1171 }
 0x3f1   : > { %2729 = vrcp.f32 %v1013_v33  ;;  %v1177_v39 = vsel %vm1031_vm5, %v1172_v36, 0 }
 0x3f4   : > { %v1124_v20 = vpop.permute.xlu1 %1123 }
 0x3f5   : > { %v1129_v34 = vsel %vm1031_vm5, %v1124_v20, 0 }
 0x3f6   : > { %v2726_v19 = vpop.eup %2725  ;;  %2531 = vmatpush3.bf16.msra.mxu1 %v1129_v34  ;;  %v3223_v34 = vld [vmem:[%s3460_s20] ss:$0 sm:$0xff] }
 0x3f7   : > { %v1019_v35 = vmul.f32 %v2726_v19, %v2718_v17  ;;  %2542 = vmatprep.subr.bf16.mxu1 %v2857_v3 }
 0x3f9   : > { %v1023_v37 = vpack.c.bf16 %v1019_v35, %v1019_v35  ;;  %v3230_v35 = vld [vmem:[%s3461_s4] ss:$0 sm:$0xff] }
 0x3fa   : > { %v2728_v38 = vpop.eup %2727 }
 0x3fb   : > { %2527 = vmatmul.mubr.msk.bf16.vlgmr.msra.gmra.mxu0 %vm784_vm3, %v1023_v37  ;;  %v1020_v40 = vmul.f32 %v2728_v38, %v2720_v21 }
 0x3fc   : > { %2537 = vmatpush3.bf16.msra.mxu0 %v1177_v39  ;;  %2538 = vmatprep.mubr.msk.bf16.mxu0 %vm2858_vm1, %v2857_v3  ;;  %v3242_v39 = vld [vmem:[#allocation7 + $0x8] sm:$0xff] }
 0x3fd   : > { %v1024_v41 = vpack.c.bf16 %v1020_v40, %v1020_v40  ;;  %2550 = vmatprep.subr.bf16.mxu0 %v2857_v3  ;;  %v1500_v40 = vpack.c.bf16 %v3242_v39, %v3242_v39 }
 0x3fe   : > { %v2730_v42 = vpop.eup %2729 }
 0x3ff   : > { %2533 = vmatmul.mubr.msk.bf16.vlgmr.msra.gmra.mxu1 %vm784_vm3, %v1024_v41  ;;  %v1021_v43 = vmul.f32 %v2730_v42, %v2722_v23  ;;  %v3258_v41 = vld [vmem:[%s3038_s18] sm:$0xff]  }
 0x400   : > { %2546 = vmatprep.mubr.msk.bf16.mxu1 %vm2858_vm1, %v2857_v3  ;;  %2543 = vmatpush3.bf16.msra.mxu1 %v3169_v49 }
 0x401   : > { %v1025_v44 = vpack.c.bf16 %v1021_v43, %v1021_v43  ;;  %2544 = vmatprep.subr.bf16.mxu1 %v2857_v3 }
 0x403   : > { %2539 = vmatmul.mubr.msk.bf16.vlgmr.msra.gmra.mxu0 %vm784_vm3, %v1025_v44 }
 0x404   : > { %2554 = vmatprep.mubr.msk.bf16.mxu0 %vm2858_vm1, %v2857_v3  ;;  %2545 = vmatpush3.bf16.msra.mxu1 %v3174_v50 }
 0x405   : > { %2558 = vmatprep.subr.bf16.mxu1 %v2857_v3  ;;  %2551 = vmatpush3.bf16.msra.mxu0 %v3199_v26 }
 0x406   : > { %2552 = vmatprep.subr.bf16.mxu0 %v2857_v3 }
 0x457   : > { %v1069_v45 = vpop.f32.mrf.mxu1 }
 0x459   : > { %v2522_v46 = vpop.f32.mrf.mxu1 }
 0x45b   : > { %v1072_v47 = vpop.f32.mrf.mxu1 }
 0x45d   : > { %v2523_v48 = vpop.f32.mrf.mxu1 }
 0x4bb   : > { %v1117_v51 = vpop.f32.mrf.mxu0 }
 0x4bc   : > { %1220 = vrot.lane.b32.xlu1 %v1117_v51, %s2864_s1 }
 0x4bd   : > { %v2528_v52 = vpop.f32.mrf.mxu0 }
 0x4bf   : > { %v1120_v53 = vpop.f32.mrf.mxu0  ;;  %v1165_v54 = vpop.f32.mrf.mxu1 }
 0x4c0   : > { %1224 = vrot.lane.b32.xlu0 %v1165_v54, %s2865_s19 }
 0x4c1   : > { %v2529_v55 = vpop.f32.mrf.mxu0  ;;  %v2534_v56 = vpop.f32.mrf.mxu1 }
 0x4c3   : > { %v1168_v57 = vpop.f32.mrf.mxu1  ;;  %v1213_v58 = vpop.f32.mrf.mxu0 }
 0x4c4   : > { %1228 = vrot.lane.b32.xlu1 %v1213_v58, %s2866_s27 }
 0x4c5   : > { %v2535_v59 = vpop.f32.mrf.mxu1  ;;  %v2540_v60 = vpop.f32.mrf.mxu0 }
 0x4c7   : > { %v1216_v61 = vpop.f32.mrf.mxu0 }
 0x4c9   : > { %v2541_v62 = vpop.f32.mrf.mxu0 }
 0x52e   : > { %v1221_v63 = vpop.permute.xlu1 %1220 }
 0x52f   : > { %v1231_v1 = vsel %vm784_vm3, %v1069_v45, %v1221_v63 }
 0x532   : > { %v1225_v0 = vpop.permute.xlu0 %1224 }
 0x533   : > { %v1233_v6 = vsel %vm1232_vm6, %v1231_v1, %v1225_v0 }
 0x536   : > { %v1229_v8 = vpop.permute.xlu1 %1228 }
 0x537   : > { %v1235_v9 = vsel %vm1234_vm7, %v1233_v6, %v1229_v8 }
 0x538   : > { %v1236_v10 = vpack.c.bf16 %v1235_v9, %v1235_v9 }
 0x53a   : > { %2547 = vmatmul.mubr.msk.bf16.vlgmr.msra.gmra.mxu1 %vm717_vm2, %v1236_v10 }
 0x53b   : > { %2566 = vmatprep.mubr.msk.bf16.mxu1 %vm2858_vm1, %v2857_v3  ;;  %2559 = vmatpush3.bf16.msra.mxu1 %v3209_v27 }
 0x53c   : > { %2560 = vmatprep.subr.bf16.mxu1 %v2857_v3 }
 0x53f   : > { %2561 = vmatpush3.bf16.msra.mxu1 %v3213_v28 }
 0x540   : > { %2562 = vmatprep.subr.bf16.mxu1 %v2857_v3 }
 0x5fa   : > { %v1292_v12 = vpop.f32.mrf.mxu1 }
 0x5fb   : > { %v1293_v13 = vadd.f32 %v3192_v11, %v1292_v12 }
 0x5fc   : > { %v2548_v14 = vpop.f32.mrf.mxu1 }
 0x5fd   : > { %v1298_v15 = vadd.f32 %v1293_v13, %v3063_v5  ;;  %v3203_v5 = vld [vmem:[%s3028_s23] sm:$0xff]  }
 0x5fe   : > { %v1295_v16 = vpop.f32.mrf.mxu1  ;;  %2553 = vmatpush3.bf16.msra.mxu0 %v3203_v5 }
 0x5ff   : > { %v1299_v17 = vsel %vm717_vm2, %v1298_v15, 0.0  ;;  %2570 = vmatprep.subr.bf16.mxu0 %v2857_v3  ;;  %v1497_v16 = vld [vmem:[#allocation2 + $0x1] sm:$0x1] }
 0x600   : > { %1300 = vadd.xlane.f32.xlu0 %v1299_v17  ;;  %v2549_v18 = vpop.f32.mrf.mxu1  ;;  %vm1498_vm9 = vcmp.eq.s32.totalorder %v1497_v16, 0 }
 0x601   : > { %v1499_v17 = vsel %vm1498_vm9, -1e+09, %v2857_v3 }
 0x602   : > { %v1562_v18 = vrot.slane %v1499_v17, %v778_v31 }
 0x689   : > { %v1301_v21 = vpop.xlane.xlu0 %1300 }
 0x68a   : > { %v1303_v22 = vmul.f32 0.03125, %v1301_v21 }
 0x68c   : > { %v1304_v23 = vsub.f32 %v1298_v15, %v1303_v22 }
 0x68e   : > { %v1305_v24 = vmul.f32 %v1304_v23, %v1304_v23 }
 0x690   : > { %v1306_v25 = vsel %vm717_vm2, %v1305_v24, 0.0 }
 0x691   : > { %1307 = vadd.xlane.f32.xlu1 %v1306_v25 }
 0x71a   : > { %v1308_v29 = vpop.xlane.xlu1 %1307 }
 0x71b   : > { %v1309_v32 = vmul.f32 0.03125, %v1308_v29 }
 0x71d   : > { %v1310_v33 = vadd.f32 1e-06, %v1309_v32 }
 0x71f   : > { %2731 = vrsqrt.f32 %v1310_v33 }
 0x72c   : > { %v2732_v20 = vpop.eup %2731 }
 0x72d   : > { %v1312_v19 = vmul.f32 %v2732_v20, %v1304_v23 }
 0x72f   : > { %v1319_v36 = vmul.f32 %v3223_v34, %v1312_v19 }
 0x731   : > { %v3234_v37 = vadd.f32 %v3230_v35, %v1319_v36 }
 0x733   : > { %v1327_v38 = vpack.c.bf16 %v3234_v37, %v3234_v37 }
 0x735   : > { %2555 = vmatmul.mubr.msk.bf16.vlgmr.msra.gmra.mxu0 %vm717_vm2, %v1327_v38 }
 0x736   : > { %2571 = vmatpush3.bf16.msra.mxu0 %v3054_v2  ;;  %2574 = vmatprep.mubr.msk.bf16.mxu0 %vm2858_vm1, %v2857_v3  ;;  %v3253_v2 = vld [vmem:[%s3038_s18 + $0x8] sm:$0xff]  }
 0x737   : > { %2572 = vmatprep.subr.bf16.mxu0 %v2857_v3  ;;  %2563 = vmatpush3.bf16.msra.mxu1 %v3253_v2 }
 0x738   : > { %2564 = vmatprep.subr.bf16.mxu1 %v2857_v3 }
 0x73a   : > { %2573 = vmatpush3.bf16.msra.mxu0 %v3059_v4  ;;  %v3267_v4 = vld [vmem:[%s641_s2] ss:$0 sm:$0xff] }
 0x73b   : > { %2578 = vmatprep.subr.bf16.mxu0 %v2857_v3  ;;  %2565 = vmatpush3.bf16.msra.mxu1 %v3258_v41 }
 0x73c   : > { %2584 = vmatprep.subr.bf16.mxu1 %v2857_v3 }
 0x73d   : > { %2575 = vmatmul.mubr.msk.bf16.vlgmr.msra.gmra.mxu0 %vm717_vm2, %v1500_v40 }
 0x73e   : > { %2580 = vmatprep.mubr.msk.bf16.mxu0 %vm2858_vm1, %v2857_v3 }
 0x7f5   : > { %v1383_v42 = vpop.f32.mrf.mxu0 }
 0x7f6   : > { %v1384_v43 = vadd.f32 %v3267_v4, %v1383_v42 }
 0x7f7   : > { %v2556_v44 = vpop.f32.mrf.mxu0 }
 0x7f8   : > { %v1389_v45 = vmax.f32 %v1384_v43, 0.0 }
 0x7f9   : > { %v1386_v46 = vpop.f32.mrf.mxu0 }
 0x7fa   : > { %v1390_v47 = vpack.c.bf16 %v1389_v45, %v1389_v45 }
 0x7fb   : > { %v2557_v48 = vpop.f32.mrf.mxu0 }
 0x7fc   : > { %2567 = vmatmul.mubr.msk.bf16.vlgmr.msra.gmra.mxu1 %vm1421_vm8, %v1390_v47 }
 0x7fd   : > { %v1538_v51 = vpop.f32.mrf.mxu0  ;;  %2586 = vmatprep.mubr.msk.bf16.mxu1 %vm2858_vm1, %v2857_v3 }
 0x7fe   : > { %v1539_v52 = vadd.f32 %v3080_v7, %v1538_v51 }
 0x7ff   : > { %v2576_v53 = vpop.f32.mrf.mxu0 }
 0x800   : > { %1548 = vrot.lane.b32.xlu1 %v1539_v52, %s2861_s28  ;;  %1545 = vrot.lane.b32.xlu0 %v1539_v52, %s2860_s26  ;;  %v3276_v55 = vpack.c.bf16 %v1539_v52, %v1539_v52 }
 0x801   : > { %v1541_v54 = vpop.f32.mrf.mxu0 }
 0x803   : > { %v2577_v56 = vpop.f32.mrf.mxu0 }
 0x804   : > { %1551 = vrot.lane.b32.xlu0 %v1539_v52, %s2859_s25  ;;  %1565 = vrot.lane.b32.xlu1 %v3276_v55, %s2862_s30 }
 0x872   : > { %v1549_v57 = vpop.permute.xlu1 %1548  ;;  %v1546_v58 = vpop.permute.xlu0 %1545 }
 0x873   : > { %v3281_v59 = vpack.c.bf16 %v1549_v57, %v1549_v57  ;;  %v3283_v60 = vpack.c.bf16 %v1546_v58, %v1546_v58 }
 0x875   : > { %1614 = vrot.lane.b32.xlu0 %v3283_v60, %s2862_s30  ;;  %1663 = vrot.lane.b32.xlu1 %v3281_v59, %s2862_s30 }
 0x876   : > { %v1552_v7 = vpop.permute.xlu0 %1551  ;;  %v1566_v61 = vpop.permute.xlu1 %1565 }
 0x877   : > { %v3289_v62 = vpack.c.bf16 %v1552_v7, %v1552_v7  ;;  %v1571_v63 = vsel %vm784_vm3, %v1566_v61, 0 }
 0x878   : > { %2579 = vmatpush3.bf16.xpose.msra.mxu0 %v1571_v63 }
 0x879   : > { %1712 = vrot.lane.b32.xlu0 %v3289_v62, %s2862_s30  ;;  %2590 = vmatprep.subr.bf16.mxu0 %v2857_v3 }
 0x87f   : > { %2581 = vmatmul.mubr.msk.bf16.vlgmr.msra.gmra.mxu0 %vm784_vm3, %v3276_v55 }
 0x880   : > { %2592 = vmatprep.mubr.msk.bf16.mxu0 %vm2858_vm1, %v2857_v3 }
 0x8bc   : > { %v3299_v0 = vpop.f32.mrf.mxu1 }
 0x8be   : > { %v2568_v1 = vpop.f32.mrf.mxu1 }
 0x8c0   : > { %v1462_v6 = vpop.f32.mrf.mxu1 }
 0x8c2   : > { %v2569_v8 = vpop.f32.mrf.mxu1 }
 0x8e7   : > { %v1615_v9 = vpop.permute.xlu0 %1614  ;;  %v1664_v10 = vpop.permute.xlu1 %1663 }
 0x8e8   : > { %v1620_v12 = vsel %vm784_vm3, %v1615_v9, 0  ;;  %v1669_v13 = vsel %vm784_vm3, %v1664_v10, 0 }
 0x8e9   : > { %2585 = vmatpush3.bf16.xpose.msra.mxu1 %v1620_v12  ;;  %2591 = vmatpush3.bf16.xpose.msra.mxu0 %v1669_v13 }
 0x8ea   : > { %2596 = vmatprep.subr.bf16.mxu1 %v2857_v3  ;;  %2602 = vmatprep.subr.bf16.mxu0 %v2857_v3 }
 0x8eb   : > { %v1713_v14 = vpop.permute.xlu0 %1712 }
 0x8ec   : > { %v1718_v15 = vsel %vm784_vm3, %v1713_v14, 0 }
 0x8f0   : > { %2587 = vmatmul.mubr.msk.bf16.vlgmr.msra.gmra.mxu1 %vm784_vm3, %v3283_v60  ;;  %2593 = vmatmul.mubr.msk.bf16.vlgmr.msra.gmra.mxu0 %vm784_vm3, %v3281_v59 }
 0x8f1   : > { %2597 = vmatpush3.bf16.xpose.msra.mxu1 %v1718_v15  ;;  %2598 = vmatprep.mubr.msk.bf16.mxu1 %vm2858_vm1, %v2857_v3 }
 0x8f2   : > { %2608 = vmatprep.subr.bf16.mxu1 %v2857_v3  ;;  %2604 = vmatprep.mubr.msk.bf16.mxu0 %vm2858_vm1, %v2857_v3 }
 0x8f8   : > { %2599 = vmatmul.mubr.msk.bf16.vlgmr.msra.gmra.mxu1 %vm784_vm3, %v3289_v62 }
 0x8f9   : > { %2610 = vmatprep.mubr.msk.bf16.mxu1 %vm2858_vm1, %v2857_v3 }
 0x93f   : > { %v1607_v21 = vpop.f32.mrf.mxu0 }
 0x940   : > { %v1608_v22 = vadd.f32 %v1607_v21, %v1562_v18 }
 0x941   : > { %v2582_v23 = vpop.f32.mrf.mxu0 }
 0x942   : > { %v1760_v24 = vsel %vm784_vm3, %v1608_v22, -inf }
 0x943   : > { %1761 = vmax.xlane.f32.xlu1 %v1760_v24  ;;  %v1610_v25 = vpop.f32.mrf.mxu0 }
 0x945   : > { %v2583_v29 = vpop.f32.mrf.mxu0 }
 0x9b0   : > { %v1656_v32 = vpop.f32.mrf.mxu1  ;;  %v1705_v33 = vpop.f32.mrf.mxu0 }
 0x9b1   : > { %v1657_v20 = vadd.f32 %v1656_v32, %v1562_v18  ;;  %v1706_v38 = vadd.f32 %v1705_v33, %v1562_v18 }
 0x9b2   : > { %v2588_v19 = vpop.f32.mrf.mxu1  ;;  %v2594_v36 = vpop.f32.mrf.mxu0 }
 0x9b3   : > { %v1763_v40 = vsel %vm784_vm3, %v1657_v20, -inf  ;;  %v1766_v44 = vsel %vm784_vm3, %v1706_v38, -inf }
 0x9b4   : > { %v1708_v42 = vpop.f32.mrf.mxu0  ;;  %1764 = vmax.xlane.f32.xlu0 %v1763_v40  ;;  %v1659_v30 = vpop.f32.mrf.mxu1 }
 0x9b6   : > { %v2589_v31 = vpop.f32.mrf.mxu1  ;;  %v2595_v43 = vpop.f32.mrf.mxu0 }
 0x9b8   : > { %1767 = vmax.xlane.f32.xlu0 %v1766_v44  ;;  %v1754_v45 = vpop.f32.mrf.mxu1 }
 0x9b9   : > { %v1755_v46 = vadd.f32 %v1754_v45, %v1562_v18 }
 0x9ba   : > { %v2600_v47 = vpop.f32.mrf.mxu1 }
 0x9bb   : > { %v1769_v48 = vsel %vm784_vm3, %v1755_v46, -inf }
 0x9bc   : > { %1770 = vmax.xlane.f32.xlu1 %v1769_v48  ;;  %v1757_v51 = vpop.f32.mrf.mxu1 }
 0x9be   : > { %v2601_v52 = vpop.f32.mrf.mxu1 }
 0x9cc   : > { %v1762_v53 = vpop.xlane.xlu1 %1761 }
 0x9cd   : > { %1856 = vrot.lane.b32.xlu1 %v3283_v60, %s2863_s0  ;;  %v1772_v54 = vsub.f32 %v1608_v22, %v1762_v53 }
 0x9ce   : > { %1808 = vrot.lane.b32.xlu0 %v3276_v55, %s2863_s0 }
 0x9cf   : > { %v1776_v56 = vmul.f32 1.442695, %v1772_v54 }
 0x9d1   : > { %2733 = vpow2.f32 %v1776_v56 }
 0x9de   : > { %v2734_v57 = vpop.eup %2733 }
 0x9df   : > { %v1784_v58 = vsel %vm784_vm3, %v2734_v57, 0.0 }
 0x9ed   : > { %1785 = vadd.xlane.f32.xlu0 %v1784_v58 }
 0xa3d   : > { %v1765_v7 = vpop.xlane.xlu0 %1764 }
 0xa3e   : > { %v1773_v61 = vsub.f32 %v1657_v20, %v1765_v7 }
 0xa40   : > { %v1778_v63 = vmul.f32 1.442695, %v1773_v61 }
 0xa41   : > { %v1768_v1 = vpop.xlane.xlu0 %1767 }
 0xa42   : > { %2735 = vpow2.f32 %v1778_v63  ;;  %v1774_v6 = vsub.f32 %v1706_v38, %v1768_v1 }
 0xa44   : > { %v1780_v8 = vmul.f32 1.442695, %v1774_v6 }
 0xa45   : > { %v1809_v9 = vpop.permute.xlu0 %1808  ;;  %v1771_v60 = vpop.xlane.xlu1 %1770 }
 0xa46   : > { %2737 = vpow2.f32 %v1780_v8  ;;  %v1814_v55 = vsel %vm1031_vm5, %v1809_v9, 0  ;;  %v1775_v10 = vsub.f32 %v1755_v46, %v1771_v60 }
 0xa47   : > { %2603 = vmatpush3.bf16.msra.mxu0 %v1814_v55 }
 0xa48   : > { %v1782_v12 = vmul.f32 1.442695, %v1775_v10  ;;  %2614 = vmatprep.subr.bf16.mxu0 %v2857_v3 }
 0xa49   : > { %v1857_v13 = vpop.permute.xlu1 %1856 }
 0xa4a   : > { %2739 = vpow2.f32 %v1782_v12  ;;  %v1862_v14 = vsel %vm1031_vm5, %v1857_v13, 0 }
 0xa4b   : > { %2609 = vmatpush3.bf16.msra.mxu1 %v1862_v14 }
 0xa4c   : > { %2620 = vmatprep.subr.bf16.mxu1 %v2857_v3 }
 0xa4f   : > { %v2736_v15 = vpop.eup %2735 }
 0xa50   : > { %v1787_v16 = vsel %vm784_vm3, %v2736_v15, 0.0 }
 0xa51   : > { %1788 = vadd.xlane.f32.xlu1 %v1787_v16 }
 0xa53   : > { %v2738_v17 = vpop.eup %2737 }
 0xa54   : > { %v1790_v18 = vsel %vm784_vm3, %v2738_v17, 0.0 }
 0xa55   : > { %1791 = vadd.xlane.f32.xlu0 %v1790_v18 }
 0xa57   : > { %v2740_v21 = vpop.eup %2739 }
 0xa58   : > { %v1793_v22 = vsel %vm784_vm3, %v2740_v21, 0.0 }
 0xa59   : > { %1794 = vadd.xlane.f32.xlu1 %v1793_v22 }
 0xa6a   : > { %1904 = vrot.lane.b32.xlu1 %v3281_v59, %s2863_s0 }
 0xa6b   : > { %1952 = vrot.lane.b32.xlu0 %v3289_v62, %s2863_s0 }
 0xa76   : > { %v1786_v23 = vpop.xlane.xlu0 %1785 }
 0xa77   : > { %2741 = vrcp.f32 %v1786_v23 }
 0xa84   : > { %v2742_v24 = vpop.eup %2741 }
 0xa85   : > { %v1800_v25 = vmul.f32 %v2742_v24, %v2734_v57 }
 0xa87   : > { %v1804_v29 = vpack.c.bf16 %v1800_v25, %v1800_v25 }
 0xa89   : > { %2605 = vmatmul.mubr.msk.bf16.vlgmr.msra.gmra.mxu0 %vm784_vm3, %v1804_v29 }
 0xa8a   : > { %2616 = vmatprep.mubr.msk.bf16.mxu0 %vm2858_vm1, %v2857_v3 }
 0xada   : > { %v1789_v32 = vpop.xlane.xlu1 %1788 }
 0xadb   : > { %2743 = vrcp.f32 %v1789_v32 }
 0xade   : > { %v1792_v33 = vpop.xlane.xlu0 %1791 }
 0xadf   : > { %2745 = vrcp.f32 %v1792_v33 }
 0xae2   : > { %v1795_v20 = vpop.xlane.xlu1 %1794  ;;  %v1953_v38 = vpop.permute.xlu0 %1952 }
 0xae3   : > { %2747 = vrcp.f32 %v1795_v20  ;;  %v1958_v30 = vsel %vm1031_vm5, %v1953_v38, 0 }
 0xae6   : > { %v1905_v59 = vpop.permute.xlu1 %1904 }
 0xae7   : > { %v1910_v19 = vsel %vm1031_vm5, %v1905_v59, 0 }
 0xae8   : > { %v2744_v62 = vpop.eup %2743  ;;  %2615 = vmatpush3.bf16.msra.mxu0 %v1910_v19 }
 0xae9   : > { %v1801_v36 = vmul.f32 %v2744_v62, %v2736_v15  ;;  %2626 = vmatprep.subr.bf16.mxu0 %v2857_v3 }
 0xaeb   : > { %v1805_v40 = vpack.c.bf16 %v1801_v36, %v1801_v36 }
 0xaec   : > { %v2746_v42 = vpop.eup %2745 }
 0xaed   : > { %2611 = vmatmul.mubr.msk.bf16.vlgmr.msra.gmra.mxu1 %vm784_vm3, %v1805_v40  ;;  %v1802_v31 = vmul.f32 %v2746_v42, %v2738_v17  ;;  %v2404_v42 = vld [vmem:[%s652_s21] ss:$0 sm:$0xff] }
 0xaee   : > { %2621 = vmatpush3.bf16.msra.mxu1 %v1958_v30  ;;  %2622 = vmatprep.mubr.msk.bf16.mxu1 %vm2858_vm1, %v2857_v3 }
 0xaef   : > { %v1806_v43 = vpack.c.bf16 %v1802_v31, %v1802_v31  ;;  %2634 = vmatprep.subr.bf16.mxu1 %v2857_v3 }
 0xaf0   : > { %v2748_v44 = vpop.eup %2747 }
 0xaf1   : > { %2617 = vmatmul.mubr.msk.bf16.vlgmr.msra.gmra.mxu0 %vm784_vm3, %v1806_v43  ;;  %v1803_v45 = vmul.f32 %v2748_v44, %v2740_v21  ;;  %v2405_v43 = vld [vmem:[%s655_s29] ss:$0 sm:$0xff]  ;;  %s2867_s29 = smov [#allocation7]  }
 0xaf2   : > { %2627 = vmatpush3.bf16.msra.mxu0 %v3169_v49  ;;  %2630 = vmatprep.mubr.msk.bf16.mxu0 %vm2858_vm1, %v2857_v3  ;;  %s2187_s15 = sshll.u32 %s2867_s29, 4  ;;  %s2188_s15 = int_to_ptr.vmem [resolvable:$true] %s2187_s15 }
 0xaf3   : > { %v1807_v46 = vpack.c.bf16 %v1803_v45, %v1803_v45  ;;  %2628 = vmatprep.subr.bf16.mxu0 %v2857_v3  ;;  %s2807_s21 = scalar_lea.vmem %s2188_s15, 256  ;;  %p2814_p13 = scmp.lt.s32.totalorder %s2188_s15, %s2188_s15 }
 0xaf4   : > { %p2808_p6 = scmp.ne.s32.totalorder %s2188_s15, %s2807_s21  ;;  %p2815_p0 = scmp.lt.s32.totalorder %s2807_s21, %s2807_s21 }
 0xaf5   : > { %2623 = vmatmul.mubr.msk.bf16.vlgmr.msra.gmra.mxu1 %vm784_vm3, %v1807_v46 }
 0xaf6   : > { %2629 = vmatpush3.bf16.msra.mxu0 %v3174_v50  ;;  %2635 = vmatpush3.bf16.msra.mxu1 %v3199_v26  ;;  %p2809_p7 = pnand %p2808_p6, %p2677_p4  ;;  %p2816_p1 = por %p2815_p0, %p2814_p13 }
 0xaf7   : > { %2636 = vmatprep.subr.bf16.mxu1 %v2857_v3  ;;  %2638 = vmatprep.mubr.msk.bf16.mxu1 %vm2858_vm1, %v2857_v3 }
 0xaf8   : > { %2642 = vmatprep.subr.bf16.mxu0 %v2857_v3  ;;  %p2810_p12 = pneg %p2809_p7 }
 0xafa   : > { %2637 = vmatpush3.bf16.msra.mxu1 %v3203_v5  ;;  %p2817_p5 = pnand %p2816_p1, %p2810_p12 }
 0xb49   : > { %v1850_v49 = vpop.f32.mrf.mxu0 }
 0xb4b   : > { %v2606_v47 = vpop.f32.mrf.mxu0 }
 0xb4d   : > { %v1853_v48 = vpop.f32.mrf.mxu0 }
 0xb4f   : > { %v2607_v51 = vpop.f32.mrf.mxu0 }
 0xbad   : > { %v1898_v52 = vpop.f32.mrf.mxu1 }
 0xbae   : > { %2001 = vrot.lane.b32.xlu1 %v1898_v52, %s2864_s1 }
 0xbaf   : > { %v2612_v53 = vpop.f32.mrf.mxu1 }
 0xbb1   : > { %v1901_v50 = vpop.f32.mrf.mxu1  ;;  %v1946_v54 = vpop.f32.mrf.mxu0 }
 0xbb2   : > { %2005 = vrot.lane.b32.xlu0 %v1946_v54, %s2865_s19 }
 0xbb3   : > { %v2613_v26 = vpop.f32.mrf.mxu1  ;;  %v2618_v56 = vpop.f32.mrf.mxu0 }
 0xbb5   : > { %v1949_v57 = vpop.f32.mrf.mxu0  ;;  %v1994_v58 = vpop.f32.mrf.mxu1 }
 0xbb6   : > { %2009 = vrot.lane.b32.xlu1 %v1994_v58, %s2866_s27 }
 0xbb7   : > { %v2619_v7 = vpop.f32.mrf.mxu0  ;;  %v2624_v5 = vpop.f32.mrf.mxu1 }
 0xbb9   : > { %v1997_v61 = vpop.f32.mrf.mxu1 }
 0xbbb   : > { %v2625_v63 = vpop.f32.mrf.mxu1 }
 0xc20   : > { %v2002_v1 = vpop.permute.xlu1 %2001 }
 0xc21   : > { %v2012_v8 = vsel %vm784_vm3, %v1850_v49, %v2002_v1 }
 0xc24   : > { %v2006_v6 = vpop.permute.xlu0 %2005 }
 0xc25   : > { %v2013_v9 = vsel %vm1232_vm6, %v2012_v8, %v2006_v6 }
 0xc28   : > { %v2010_v60 = vpop.permute.xlu1 %2009 }
 0xc29   : > { %v2014_v55 = vsel %vm1234_vm7, %v2013_v9, %v2010_v60 }
 0xc2a   : > { %v2015_v10 = vpack.c.bf16 %v2014_v55, %v2014_v55 }
 0xc2c   : > { %2631 = vmatmul.mubr.msk.bf16.vlgmr.msra.gmra.mxu0 %vm717_vm2, %v2015_v10 }
 0xc2d   : > { %2643 = vmatpush3.bf16.msra.mxu0 %v3209_v27  ;;  %2650 = vmatprep.mubr.msk.bf16.mxu0 %vm2858_vm1, %v2857_v3  ;;  %v2398_v27 = vld [vmem:[%s649_s14] ss:$0 sm:$0xff] }
 0xc2e   : > { %2644 = vmatprep.subr.bf16.mxu0 %v2857_v3  ;;  %v1460_v13 = vadd.f32 %v2398_v27, %v3299_v0 }
 0xc31   : > { %2645 = vmatpush3.bf16.msra.mxu0 %v3213_v28 }
 0xc32   : > { %2646 = vmatprep.subr.bf16.mxu0 %v2857_v3 }
 0xc35   : > { %2647 = vmatpush3.bf16.msra.mxu0 %v3253_v2 }
 0xc36   : > { %2648 = vmatprep.subr.bf16.mxu0 %v2857_v3  ;;  %v1465_v3 = vadd.f32 %v1460_v13, %v3234_v37 }
 0xc38   : > { %v1466_v17 = vsel %vm717_vm2, %v1465_v3, 0.0 }
 0xc39   : > { %2649 = vmatpush3.bf16.msra.mxu0 %v3258_v41 }
 0xcec   : > { %v2053_v12 = vpop.f32.mrf.mxu0 }
 0xced   : > { %v2054_v14 = vadd.f32 %v3192_v11, %v2053_v12 }
 0xcee   : > { %v2632_v15 = vpop.f32.mrf.mxu0 }
 0xcef   : > { %v2059_v28 = vadd.f32 %v2054_v14, %v3242_v39 }
 0xcf0   : > { %v2056_v16 = vpop.f32.mrf.mxu0 }
 0xcf1   : > { %v2060_v2 = vsel %vm717_vm2, %v2059_v28, 0.0 }
 0xcf2   : > { %2061 = vadd.xlane.f32.xlu0 %v2060_v2  ;;  %v2633_v41 = vpop.f32.mrf.mxu0 }
 0xcf6   : > { %1467 = vadd.xlane.f32.xlu0 %v1466_v17 }
 0xd7b   : > { %v2062_v18 = vpop.xlane.xlu0 %2061 }
 0xd7c   : > { %v2063_v21 = vmul.f32 0.03125, %v2062_v18 }
 0xd7e   : > { %v2064_v22 = vsub.f32 %v2059_v28, %v2063_v21 }
 0xd7f   : > { %v1468_v23 = vpop.xlane.xlu0 %1467 }
 0xd80   : > { %v1469_v0 = vmul.f32 0.03125, %v1468_v23  ;;  %v2065_v24 = vmul.f32 %v2064_v22, %v2064_v22 }
 0xd82   : > { %v1470_v11 = vsub.f32 %v1465_v3, %v1469_v0  ;;  %v2066_v25 = vsel %vm717_vm2, %v2065_v24, 0.0 }
 0xd83   : > { %2067 = vadd.xlane.f32.xlu1 %v2066_v25 }
 0xd84   : > { %v1471_v39 = vmul.f32 %v1470_v11, %v1470_v11 }
 0xd86   : > { %v1472_v29 = vsel %vm717_vm2, %v1471_v39, 0.0 }
 0xd87   : > { %1473 = vadd.xlane.f32.xlu1 %v1472_v29 }
 0xe0c   : > { %v2068_v37 = vpop.xlane.xlu1 %2067 }
 0xe0d   : > { %v2069_v32 = vmul.f32 0.03125, %v2068_v37 }
 0xe0f   : > { %v2070_v33 = vadd.f32 1e-06, %v2069_v32 }
 0xe10   : > { %v1474_v20 = vpop.xlane.xlu1 %1473 }
 0xe11   : > { %2749 = vrsqrt.f32 %v2070_v33  ;;  %v1475_v59 = vmul.f32 0.03125, %v1474_v20 }
 0xe13   : > { %v1476_v19 = vadd.f32 1e-06, %v1475_v59 }
 0xe15   : > { %2751 = vrsqrt.f32 %v1476_v19 }
 0xe1e   : > { %v2750_v62 = vpop.eup %2749 }
 0xe1f   : > { %v2072_v36 = vmul.f32 %v2750_v62, %v2064_v22 }
 0xe21   : > { %v2073_v38 = vmul.f32 %v3223_v34, %v2072_v36 }
 0xe22   : > { %v2752_v40 = vpop.eup %2751 }
 0xe23   : > { %v1478_v30 = vmul.f32 %v2752_v40, %v1470_v11  ;;  %v2074_v31 = vadd.f32 %v3230_v35, %v2073_v38 }
 0xe25   : > { %v2075_v44 = vpack.c.bf16 %v2074_v31, %v2074_v31  ;;  %v1485_v45 = vmul.f32 %v2404_v42, %v1478_v30 }
 0xe27   : > { %2639 = vmatmul.mubr.msk.bf16.vlgmr.msra.gmra.mxu1 %vm717_vm2, %v2075_v44  ;;  %v1492_v46 = vadd.f32 %v2405_v43, %v1485_v45 }
 0xe29   : > { %1493 = vst.msk [vmem:[#allocation7] sm:$0xff] %vm717_vm2, %v1492_v46 }
 0xee7   : > { %v2113_v34 = vpop.f32.mrf.mxu1 }
 0xee8   : > { %v2114_v49 = vadd.f32 %v3267_v4, %v2113_v34 }
 0xee9   : > { %v2640_v47 = vpop.f32.mrf.mxu1 }
 0xeea   : > { %v2119_v48 = vmax.f32 %v2114_v49, 0.0 }
 0xeeb   : > { %v2116_v51 = vpop.f32.mrf.mxu1 }
 0xeec   : > { %v2120_v52 = vpack.c.bf16 %v2119_v48, %v2119_v48 }
 0xeed   : > { %v2641_v35 = vpop.f32.mrf.mxu1 }
 0xeee   : > { %2651 = vmatmul.mubr.msk.bf16.vlgmr.msra.gmra.mxu0 %vm1421_vm8, %v2120_v52 }
 0xfae   : > { %v2158_v53 = vpop.f32.mrf.mxu0 }
 0xfaf   : > { %v2159_v50 = vadd.f32 %v2398_v27, %v2158_v53 }
 0xfb0   : > { %v2652_v54 = vpop.f32.mrf.mxu0 }
 0xfb1   : > { %v2164_v26 = vadd.f32 %v2159_v50, %v2074_v31 }
 0xfb2   : > { %v2161_v56 = vpop.f32.mrf.mxu0 }
 0xfb3   : > { %v2165_v57 = vsel %vm717_vm2, %v2164_v26, 0.0 }
 0xfb4   : > { %2166 = vadd.xlane.f32.xlu0 %v2165_v57  ;;  %v2653_v58 = vpop.f32.mrf.mxu0 }
0x103d   : > { %v2167_v7 = vpop.xlane.xlu0 %2166 }
0x103e   : > { %v2168_v5 = vmul.f32 0.03125, %v2167_v7 }
0x1040   : > { %v2169_v4 = vsub.f32 %v2164_v26, %v2168_v5 }
0x1042   : > { %v2170_v61 = vmul.f32 %v2169_v4, %v2169_v4 }
0x1044   : > { %v2171_v63 = vsel %vm717_vm2, %v2170_v61, 0.0 }
0x1045   : > { %2172 = vadd.xlane.f32.xlu0 %v2171_v63 }
0x10ce   : > { %v2173_v1 = vpop.xlane.xlu0 %2172 }
0x10cf   : > { %v2174_v6 = vmul.f32 0.03125, %v2173_v1 }
0x10d1   : > { %v2175_v8 = vadd.f32 1e-06, %v2174_v6 }
0x10d3   : > { %2753 = vrsqrt.f32 %v2175_v8 }
0x10e0   : > { %v2754_v9 = vpop.eup %2753 }
0x10e1   : > { %v2177_v60 = vmul.f32 %v2754_v9, %v2169_v4 }
0x10e3   : > { %v2178_v55 = vmul.f32 %v2404_v42, %v2177_v60 }
0x10e5   : > { %v2179_v10 = vadd.f32 %v2405_v43, %v2178_v55 }
0x10e7   : > { %2180 = vst.msk [vmem:[#allocation7 + $0x8] sm:$0xff] %vm717_vm2, %v2179_v10 }
0x10e8   : > { %2820 = shalt.err (!%p2817_p5)
}
0x10e9   : > { %s2868_s30 = smov 128   ;;  %s3462_s27 = sld [smem:[#allocation16_spill]] }
0x10ef   : > { %2663 = dma.vmem_to_hbm [thread:$0]  (%p2677_p4), %s2188_s15, 256, %s3462_s27, [#allocation4], %s2868_s30, %s2868_s30, %s2864_s1  }
0x10f0   : > { %2844 = dma.done.wait (%p2677_p4), [#allocation4], 256  }
0x10f1   : > { %2846 = vsyncadd (%p2677_p4), [#allocation4], 4294967040 }
0x10f2 PF: > { %s3463_s20 = sld [smem:[#allocation11_spill]] }
0x10f8   : > { %s27_s29 = sadd.s32 1, %s3463_s20  }
0x10f9   : > { %p24_p8 = scmp.ge.s32.totalorder %s27_s29, 4  }
0x10fb   :  { %26 = sbr.rel (!%p24_p8) target bundleno = 9 (0x9), region = 151 }
0x1100   :  { %2203 = vsyncpa [#allocation3], 1 }
0x1101   :  { %2205 = vsyncpa [#allocation3 + $0x1], 1 }
0x1102   :  { %2206 = vsyncpa [#allocation6], 1 }
0x1103   :  { %2207 = vsyncpa [#allocation4], 1 }
0x1104   :  { %2209 = vsyncpa [#allocation4 + $0x1], 1 }

</bundles_post_ra>
